<compile_context>
chip_gen: v6e
topology: v6e:2x2x1
jax: 0.10.0
libtpu: 0.0.40
codegen_flags: <defaults>
</compile_context>

<pallas_src>
import functools
import math

import jax
import jax.numpy as jnp
from jax.experimental import pallas as pl
from jax.experimental.pallas import tpu as pltpu


def _layernorm(x, g, b, eps=1e-5):
    mu = jnp.mean(x, axis=-1, keepdims=True)
    var = jnp.mean((x - mu) ** 2, axis=-1, keepdims=True)
    return (x - mu) * jax.lax.rsqrt(var + eps) * g + b


def _gelu_exact(x):
    # matches torch.nn.GELU() default (erf formulation)
    return 0.5 * x * (1.0 + jax.lax.erf(x / jnp.sqrt(2.0).astype(x.dtype)))


def block_kernel(*refs, n_head, with_attn):
    (x_ref, ln1g_ref, ln1b_ref, wqkv_ref, bqkv_ref, wph_ref, bp_ref,
     ln2g_ref, ln2b_ref, w1_ref, b1_ref, w2_ref, b2_ref) = refs[:13]
    if with_attn:
        out_ref, attn_ref = refs[13], refs[14]
        qh_ref, kh_ref, vh_ref, s_ref = refs[15:]
    else:
        out_ref, attn_ref = refs[13], None
        qh_ref, kh_ref, vh_ref, s_ref = refs[14:]

    TQ, C = x_ref.shape[1], x_ref.shape[2]
    H = n_head
    D = C // H
    T = kh_ref.shape[1]
    NKB = T // TQ                                # number of key blocks (static)
    cdt = kh_ref.dtype                           # MXU operand dtype
    f32 = jnp.float32
    exact = jnp.dtype(cdt) == jnp.dtype(jnp.float32)
    scale = 1.0 / math.sqrt(D)
    neg_big = jnp.float32(-1e30)                 # finite mask (no -inf NaN risk)

    qt = pl.program_id(1)
    q0 = pl.multiple_of(qt * TQ, TQ)

    # ---- incremental LN1 + fused QKV projection for this tile's rows ---------
    # K/V scratch is filled one query tile at a time; tile qt only ever reads
    # key rows [0, (qt+1)*TQ), all written by tiles 0..qt of the SAME batch
    # element.  This relies on the qt grid axis being innermost and sequential
    # ("arbitrary") -- do not reorder the grid or mark qt "parallel".
    x_t = x_ref[0].astype(f32)                                   # (TQ, C)
    h1 = _layernorm(x_t, ln1g_ref[0], ln1b_ref[0])
    qkv = jnp.dot(h1.astype(cdt), wqkv_ref[...],
                  preferred_element_type=f32) + bqkv_ref[0]
    qkv = qkv.astype(cdt)                                        # (TQ, 3C)
    # Head split via static column slices (major-dim transposes do not lower);
    # only TQ rows per step, so the store work is spread across the grid.
    for h in range(H):
        qh_ref[h] = qkv[:, h * D:(h + 1) * D]
        kh_ref[h, pl.ds(q0, TQ), :] = qkv[:, C + h * D:C + (h + 1) * D]
        vh_ref[h, pl.ds(q0, TQ), :] = qkv[:, 2 * C + h * D:2 * C + (h + 1) * D]

    qh = qh_ref[...]                                             # (H, TQ, D)
    row_ids = q0 + jax.lax.broadcasted_iota(jnp.int32, (TQ, 1), 0)

    # ---- pass 1 over key blocks kt <= qt: scores + running row max -----------
    def score_body(kt, m):
        k0 = pl.multiple_of(kt * TQ, TQ)
        kh = kh_ref[:, pl.ds(k0, TQ), :]                         # (H, TQk, D)
        s = jnp.einsum('hqd,hkd->hqk', qh, kh,
                       preferred_element_type=f32) * scale       # (H, TQ, TQk)
        col_ids = k0 + jax.lax.broadcasted_iota(jnp.int32, (1, TQ), 1)
        s = jnp.where((row_ids >= col_ids)[None], s, neg_big)    # 2-D mask, bcast over H
        s_ref[kt] = s
        return jnp.maximum(m, jnp.max(s, axis=-1, keepdims=True))

    m = jax.lax.fori_loop(0, qt + 1, score_body,
                          jnp.full((H, TQ, 1), neg_big, f32))

    # ---- pass 2 over key blocks kt <= qt: exp, denominator, P@V --------------
    def exp_body(kt, carry):
        denom, pv = carry
        e = jnp.exp(s_ref[kt] - m)                               # (H, TQ, TQk)
        s_ref[kt] = e
        denom = denom + jnp.sum(e, axis=-1, keepdims=True)
        k0 = pl.multiple_of(kt * TQ, TQ)
        vh = vh_ref[:, pl.ds(k0, TQ), :]                         # (H, TQk, D)
        pv = pv + jnp.einsum('hqk,hkd->hqd', e.astype(cdt), vh,
                             preferred_element_type=f32)
        return denom, pv

    denom, pv = jax.lax.fori_loop(
        0, qt + 1, exp_body,
        (jnp.zeros((H, TQ, 1), f32), jnp.zeros((H, TQ, D), f32)))

    # exact division in f32 mode (tight tolerance); EUP approx reciprocal otherwise
    inv = (1.0 / denom) if exact else pl.reciprocal(denom, approx=True)

    # ---- optional attention-map output (single lane-dense store) -------------
    if with_attn:
        # Blocks kt > qt hold stale data; the full causal mask selects 0 there
        # (and for the masked part of the diagonal block), so it never leaks.
        e_full = jnp.concatenate([s_ref[kt] for kt in range(NKB)], axis=-1)
        col_ids = jax.lax.broadcasted_iota(jnp.int32, (1, T), 1)
        full_mask = row_ids >= col_ids                           # (TQ, T)
        p_full = jnp.where(full_mask[None], e_full * inv, 0.0)
        attn_ref[0] = p_full.astype(attn_ref.dtype)

    # ---- head merge fused into the output projection --------------------------
    y = (pv * inv).astype(cdt)                                   # (H, TQ, D)
    yp = jnp.zeros((TQ, C), f32)
    for h in range(H):                                           # sum_h y_h @ Wp[h]
        yp = yp + jnp.dot(y[h], wph_ref[h], preferred_element_type=f32)
    yp = yp + bp_ref[0]

    # ---- first residual, LN2 + MLP --------------------------------------------
    x2 = x_t + yp
    h2 = _layernorm(x2, ln2g_ref[0], ln2b_ref[0])
    # TODO(synk): optionally compute the MLP GELU/exp in bf16 on v6e/v7x (bf16 EUP).
    mlp = jnp.dot(h2.astype(cdt), w1_ref[...], preferred_element_type=f32) + b1_ref[0]
    mlp = _gelu_exact(mlp)
    mlp = jnp.dot(mlp.astype(cdt), w2_ref[...], preferred_element_type=f32) + b2_ref[0]
    out_ref[0] = (x2 + mlp).astype(out_ref.dtype)


def _choose_q_tile(T, target=128):
    # NOTE: use target=256 on v6e (2x256x256 MXU); keep 128 on v5e / VMEM-tight v7x.
    if T <= target:
        return T
    for cand in (target, 128, 64, 32, 16, 8):
        if cand <= target and T % cand == 0:
            return cand
    return T


def _const_spec(shape):
    """Constant-index (weight/bias) block, single-buffered.

    These blocks never change across the grid; default double-buffering only
    wastes VMEM (~14-28 MiB at GPT-2 scale) -- critical headroom on v7x 64 MiB.
    """
    nd = len(shape)
    imap = lambda *_: (0,) * nd
    try:
        return pl.BlockSpec(shape, imap, pipeline_mode=pl.Buffered(1))
    except Exception:  # fallback if this jax build lacks pipeline_mode
        return pl.BlockSpec(shape, imap)


def _padded_bytes(shape, dtype):
    itemsize = jnp.dtype(dtype).itemsize
    s = [int(d) for d in shape]
    if len(s) < 2:
        s = [1] * (2 - len(s)) + s
    s[-1] = -(-s[-1] // 128) * 128
    s[-2] = -(-s[-2] // 8) * 8
    n = 1
    for d in s:
        n *= d
    return n * itemsize


def transformer_block(x, params, n_head, *, matmul_dtype=jnp.bfloat16,
                      q_tile=128, return_attn=True):
    """Fused Block forward; returns (x_out, attn) (or x_out if return_attn=False).

    matmul_dtype: dtype fed to the MXU (weights + matmul activations). Accumulation
    is always f32; LayerNorm / softmax / GELU / residual math stays in f32.
    """
    (ln1g, ln1b, wq, bq, wk, bk, wv, bv, wp, bp,
     ln2g, ln2b, w1, b1, w2, b2) = params
    B, T, C = x.shape
    H = n_head
    assert C % H == 0
    D = C // H
    F_hid = w1.shape[1]
    cdt = jnp.dtype(matmul_dtype)

    # Fused QKV weight: one (C, 3C) contraction instead of three (C, C) ones.
    wqkv = jnp.concatenate([wq, wk, wv], axis=1).astype(cdt)
    bqkv = jnp.concatenate([bq, bk, bv], axis=1)
    wph = wp.astype(cdt).reshape(H, D, C)          # head-merge fused into proj
    w1_c, w2_c = w1.astype(cdt), w2.astype(cdt)

    tq = _choose_q_tile(T, q_tile)
    nq = T // tq

    in_specs = [
        # per-tile rows only (incremental QKV): (1, TQ, C)
        pl.BlockSpec((1, tq, C), lambda b, qt: (b, qt, 0)),
        _const_spec((1, C)), _const_spec((1, C)),          # ln1 gamma / beta
        _const_spec((C, 3 * C)), _const_spec((1, 3 * C)),  # Wqkv, bqkv (fused)
        _const_spec((H, D, C)), _const_spec((1, C)),       # Wproj (H,D,C), bproj
        _const_spec((1, C)), _const_spec((1, C)),          # ln2 gamma / beta
        _const_spec((C, F_hid)), _const_spec((1, F_hid)),  # W1, b1
        _const_spec((F_hid, C)), _const_spec((1, C)),      # W2, b2
    ]
    out_spec_x = pl.BlockSpec((1, tq, C), lambda b, qt: (b, qt, 0))
    if return_attn:
        out_specs = (out_spec_x,
                     pl.BlockSpec((1, H, tq, T), lambda b, qt: (b, 0, qt, 0)))
        out_shape = (jax.ShapeDtypeStruct((B, T, C), x.dtype),
                     jax.ShapeDtypeStruct((B, H, T, T), x.dtype))
    else:
        out_specs = out_spec_x
        out_shape = jax.ShapeDtypeStruct((B, T, C), x.dtype)

    scratch_shapes = [
        pltpu.VMEM((H, tq, D), cdt),                 # q (current tile, head-split)
        pltpu.VMEM((H, T, D), cdt),                  # k (persistent across qt)
        pltpu.VMEM((H, T, D), cdt),                  # v (persistent across qt)
        pltpu.VMEM((nq, H, tq, tq), jnp.float32),    # per-key-block scores / exp
    ]

    # ---- VMEM budget (feedback: derive from footprint, esp. v7x 64 MiB/TC) ----
    est = 0
    for shp in ((C, 3 * C), (H, D, C), (C, F_hid), (F_hid, C)):
        est += _padded_bytes(shp, cdt)                       # single-buffered weights
    for shp in ((1, C),) * 6 + ((1, 3 * C), (1, F_hid)):
        est += 2 * _padded_bytes(shp, jnp.float32)           # small params
    est += 4 * _padded_bytes((1, tq, C), x.dtype)            # x in + out (double-buffered)
    if return_attn:
        est += 2 * _padded_bytes((1, H, tq, T), x.dtype)
    est += _padded_bytes((H, tq, D), cdt) + 2 * _padded_bytes((H, T, D), cdt)
    est += _padded_bytes((nq, H, tq, tq), jnp.float32)
    vmem_limit = max(32 << 20, min(int(est * 1.5) + (2 << 20), 100 << 20))

    # ---- advisory cost estimate (causal attention: ~ (T+tq)/2 keys per query) -
    avg_keys = (T + tq) / 2.0
    itemsize = jnp.dtype(x.dtype).itemsize
    flops = (2 * B * T * C * 3 * C
             + 4 * B * H * T * avg_keys * D
             + 2 * B * T * C * C
             + 4 * B * T * C * F_hid)
    transcendentals = B * H * T * avg_keys + B * T * F_hid
    bytes_accessed = (2 * B * T * C * itemsize
                      + (B * H * T * T * itemsize if return_attn else 0)
                      + int(cdt.itemsize) * (3 * C * C + C * C + 2 * C * F_hid)
                      + 4 * (9 * C + F_hid))
    cost = pl.CostEstimate(flops=int(flops),
                           transcendentals=int(transcendentals),
                           bytes_accessed=int(bytes_accessed))

    kernel = functools.partial(block_kernel, n_head=H, with_attn=return_attn)
    # NOTE (v7x megacore): only the batch axis is "parallel"; prefer an even
    # per-chip batch so both TensorCores stay busy.  The qt axis must remain
    # "arbitrary" (sequential) because K/V scratch is carried across it.
    return pl.pallas_call(
        kernel,
        grid=(B, nq),
        in_specs=in_specs,
        out_specs=out_specs,
        out_shape=out_shape,
        scratch_shapes=scratch_shapes,
        compiler_params=pltpu.CompilerParams(
            dimension_semantics=("parallel", "arbitrary"),
            vmem_limit_bytes=int(vmem_limit)),
        cost_estimate=cost,
    )(x, ln1g, ln1b, wqkv, bqkv, wph, bp, ln2g, ln2b, w1_c, b1, w2_c, b2)


def reference_block(x, params, n_head):
    (ln1g, ln1b, wq, bq, wk, bk, wv, bv, wp, bp,
     ln2g, ln2b, w1, b1, w2, b2) = params
    B, T, C = x.shape
    D = C // n_head
    h1 = _layernorm(x, ln1g[0], ln1b[0])
    q = (h1 @ wq + bq[0]).reshape(B, T, n_head, D).transpose(0, 2, 1, 3)
    k = (h1 @ wk + bk[0]).reshape(B, T, n_head, D).transpose(0, 2, 1, 3)
    v = (h1 @ wv + bv[0]).reshape(B, T, n_head, D).transpose(0, 2, 1, 3)
    att = jnp.einsum('bhtd,bhsd->bhts', q, k) / math.sqrt(D)
    mask = jnp.tril(jnp.ones((T, T), bool))
    att = jnp.where(mask[None, None], att, -jnp.inf)
    att = jax.nn.softmax(att, axis=-1)
    y = jnp.einsum('bhts,bhsd->bhtd', att, v).transpose(0, 2, 1, 3).reshape(B, T, C)
    y = y @ wp + bp[0]
    x2 = x + y
    h2 = _layernorm(x2, ln2g[0], ln2b[0])
    m = _gelu_exact(h2 @ w1 + b1[0]) @ w2 + b2[0]
    return x2 + m, att


if __name__ == "__main__":
    # small config: n_embd=32, n_head=4, block_size (T) = 8, batch = 2
    B, T, C, H = 2, 8, 32, 4

    key = jax.random.PRNGKey(0)
    ks = jax.random.split(key, 12)
    std = 0.02

    def lin(k, din, dout):
        # weights stored pre-transposed (din, dout) so kernel does x @ W + b
        kw, kb = jax.random.split(k)
        return (std * jax.random.normal(kw, (din, dout), jnp.float32),
                std * jax.random.normal(kb, (1, dout), jnp.float32))

    wq, bq = lin(ks[0], C, C)
    wk, bk = lin(ks[1], C, C)
    wv, bv = lin(ks[2], C, C)
    wp, bp = lin(ks[3], C, C)
    w1, b1 = lin(ks[4], C, 4 * C)
    w2, b2 = lin(ks[5], 4 * C, C)
    ln1g = jnp.ones((1, C), jnp.float32)
    ln1b = jnp.zeros((1, C), jnp.float32)
    ln2g = jnp.ones((1, C), jnp.float32)
    ln2b = jnp.zeros((1, C), jnp.float32)

    params = (ln1g, ln1b, wq, bq, wk, bk, wv, bv, wp, bp,
              ln2g, ln2b, w1, b1, w2, b2)

    x = jax.random.normal(ks[6], (B, T, C), jnp.float32)

    # TODO(synk): attn_pdrop / resid_pdrop dropout omitted (eval-mode identity).
    ref_out, ref_attn = reference_block(x, params, H)

    # exact-precision path (f32 MXU operands)
    out, attn = jax.block_until_ready(
        transformer_block(x, params, H, matmul_dtype=jnp.float32))
    assert jnp.allclose(out, ref_out, rtol=1e-4, atol=1e-4), "f32 output mismatch"
    assert jnp.allclose(attn, ref_attn, rtol=1e-4, atol=1e-4), "f32 attn mismatch"

    # throughput path: bf16 MXU operands, f32 accumulation (v6e/v7x mode)
    out16, attn16 = jax.block_until_ready(
        transformer_block(x, params, H, matmul_dtype=jnp.bfloat16))
    assert jnp.allclose(out16, ref_out, rtol=2e-2, atol=2e-2), "bf16 output mismatch"
    assert jnp.allclose(attn16, ref_attn, rtol=2e-2, atol=2e-2), "bf16 attn mismatch"

    # attention-map-free path (drops the O(T^2) HBM writeback entirely)
    out_na = jax.block_until_ready(
        transformer_block(x, params, H, matmul_dtype=jnp.float32, return_attn=False))
    assert jnp.allclose(out_na, ref_out, rtol=1e-4, atol=1e-4), "no-attn output mismatch"

    print("KERNEL_OK")
</pallas_src>

<mosaic_0001>
module attributes {stable_mosaic.version = 11 : i64} {
  func.func @block_kernel(%arg0: i32, %arg1: i32, %arg2: memref<1x8x32xf32, #tpu.memory_space<vmem>>, %arg3: memref<1x32xf32, #tpu.memory_space<vmem>>, %arg4: memref<1x32xf32, #tpu.memory_space<vmem>>, %arg5: memref<32x96xf32, #tpu.memory_space<vmem>>, %arg6: memref<1x96xf32, #tpu.memory_space<vmem>>, %arg7: memref<4x8x32xf32, #tpu.memory_space<vmem>>, %arg8: memref<1x32xf32, #tpu.memory_space<vmem>>, %arg9: memref<1x32xf32, #tpu.memory_space<vmem>>, %arg10: memref<1x32xf32, #tpu.memory_space<vmem>>, %arg11: memref<32x128xf32, #tpu.memory_space<vmem>>, %arg12: memref<1x128xf32, #tpu.memory_space<vmem>>, %arg13: memref<128x32xf32, #tpu.memory_space<vmem>>, %arg14: memref<1x32xf32, #tpu.memory_space<vmem>>, %arg15: memref<1x8x32xf32, #tpu.memory_space<vmem>>, %arg16: memref<1x4x8x8xf32, #tpu.memory_space<vmem>>, %arg17: memref<4x8x8xf32, #tpu.memory_space<vmem>>, %arg18: memref<4x8x8xf32, #tpu.memory_space<vmem>>, %arg19: memref<4x8x8xf32, #tpu.memory_space<vmem>>, %arg20: memref<1x4x8x8xf32, #tpu.memory_space<vmem>>) attributes {dimension_semantics = [#tpu.dimension_semantics<parallel>, #tpu.dimension_semantics<arbitrary>], iteration_bounds = array<i64: 2, 1>, scalar_prefetch = 0 : i64, scratch_operands = 4 : i64, tpu.core_type = #tpu.core_type<tc>, window_params = [{transform_indices = @transform_0, window_bounds = array<i64: 1, 8, 32>}, {pipeline_mode = #tpu.pipeline_mode<synchronous>, transform_indices = @transform_1, window_bounds = array<i64: 1, 32>}, {pipeline_mode = #tpu.pipeline_mode<synchronous>, transform_indices = @transform_2, window_bounds = array<i64: 1, 32>}, {pipeline_mode = #tpu.pipeline_mode<synchronous>, transform_indices = @transform_3, window_bounds = array<i64: 32, 96>}, {pipeline_mode = #tpu.pipeline_mode<synchronous>, transform_indices = @transform_4, window_bounds = array<i64: 1, 96>}, {pipeline_mode = #tpu.pipeline_mode<synchronous>, transform_indices = @transform_5, window_bounds = array<i64: 4, 8, 32>}, {pipeline_mode = #tpu.pipeline_mode<synchronous>, transform_indices = @transform_6, window_bounds = array<i64: 1, 32>}, {pipeline_mode = #tpu.pipeline_mode<synchronous>, transform_indices = @transform_7, window_bounds = array<i64: 1, 32>}, {pipeline_mode = #tpu.pipeline_mode<synchronous>, transform_indices = @transform_8, window_bounds = array<i64: 1, 32>}, {pipeline_mode = #tpu.pipeline_mode<synchronous>, transform_indices = @transform_9, window_bounds = array<i64: 32, 128>}, {pipeline_mode = #tpu.pipeline_mode<synchronous>, transform_indices = @transform_10, window_bounds = array<i64: 1, 128>}, {pipeline_mode = #tpu.pipeline_mode<synchronous>, transform_indices = @transform_11, window_bounds = array<i64: 128, 32>}, {pipeline_mode = #tpu.pipeline_mode<synchronous>, transform_indices = @transform_12, window_bounds = array<i64: 1, 32>}, {transform_indices = @transform_13, window_bounds = array<i64: 1, 8, 32>}, {transform_indices = @transform_14, window_bounds = array<i64: 1, 4, 8, 8>}]} {
    %c8_i32 = arith.constant 8 : i32
    %0 = arith.muli %arg1, %c8_i32 : i32
    %1 = tpu.assume_multiple %0, 8 : i32
    %c0 = arith.constant 0 : index
    %c0_0 = arith.constant 0 : index
    %c0_1 = arith.constant 0 : index
    %2 = vector.load %arg2[%c0, %c0_0, %c0_1] : memref<1x8x32xf32, #tpu.memory_space<vmem>>, vector<1x8x32xf32>
    %3 = vector.shape_cast %2 : vector<1x8x32xf32> to vector<8x32xf32>
    %c0_2 = arith.constant 0 : index
    %c0_3 = arith.constant 0 : index
    %4 = vector.load %arg3[%c0_2, %c0_3] : memref<1x32xf32, #tpu.memory_space<vmem>>, vector<1x32xf32>
    %5 = vector.shape_cast %4 : vector<1x32xf32> to vector<32xf32>
    %c0_4 = arith.constant 0 : index
    %c0_5 = arith.constant 0 : index
    %6 = vector.load %arg4[%c0_4, %c0_5] : memref<1x32xf32, #tpu.memory_space<vmem>>, vector<1x32xf32>
    %7 = vector.shape_cast %6 : vector<1x32xf32> to vector<32xf32>
    %cst = arith.constant dense<0.000000e+00> : vector<8xf32>
    %8 = vector.multi_reduction <add>, %3, %cst [1] : vector<8x32xf32> to vector<8xf32>
    %9 = vector.shape_cast %8 : vector<8xf32> to vector<8x1xf32>
    %cst_6 = arith.constant 3.200000e+01 : f32
    %10 = vector.broadcast %cst_6 : f32 to vector<8x1xf32>
    %11 = arith.divf %9, %10 : vector<8x1xf32>
    %12 = vector.broadcast %11 : vector<8x1xf32> to vector<8x32xf32>
    %13 = arith.subf %3, %12 : vector<8x32xf32>
    %14 = arith.mulf %13, %13 : vector<8x32xf32>
    %cst_7 = arith.constant dense<0.000000e+00> : vector<8xf32>
    %15 = vector.multi_reduction <add>, %14, %cst_7 [1] : vector<8x32xf32> to vector<8xf32>
    %16 = vector.shape_cast %15 : vector<8xf32> to vector<8x1xf32>
    %cst_8 = arith.constant 3.200000e+01 : f32
    %17 = vector.broadcast %cst_8 : f32 to vector<8x1xf32>
    %18 = arith.divf %16, %17 : vector<8x1xf32>
    %19 = vector.broadcast %11 : vector<8x1xf32> to vector<8x32xf32>
    %20 = arith.subf %3, %19 : vector<8x32xf32>
    %cst_9 = arith.constant 9.99999974E-6 : f32
    %21 = vector.broadcast %cst_9 : f32 to vector<8x1xf32>
    %22 = arith.addf %18, %21 : vector<8x1xf32>
    %23 = math.rsqrt %22 : vector<8x1xf32>
    %24 = vector.broadcast %23 : vector<8x1xf32> to vector<8x32xf32>
    %25 = arith.mulf %20, %24 : vector<8x32xf32>
    %26 = vector.shape_cast %5 : vector<32xf32> to vector<1x32xf32>
    %27 = vector.broadcast %26 : vector<1x32xf32> to vector<8x32xf32>
    %28 = arith.mulf %25, %27 : vector<8x32xf32>
    %29 = vector.shape_cast %7 : vector<32xf32> to vector<1x32xf32>
    %30 = vector.broadcast %29 : vector<1x32xf32> to vector<8x32xf32>
    %31 = arith.addf %28, %30 : vector<8x32xf32>
    %c0_10 = arith.constant 0 : index
    %c0_11 = arith.constant 0 : index
    %32 = vector.load %arg5[%c0_10, %c0_11] : memref<32x96xf32, #tpu.memory_space<vmem>>, vector<32x96xf32>
    %cst_12 = arith.constant dense<0.000000e+00> : vector<8x96xf32>
    %33 = tpu.matmul %31, %32, %cst_12 {dimension_numbers = #tpu.dot_dimension_numbers<[1], [0], [0], [1], [0, 0, 1, 1], [], []>} : vector<8x32xf32>, vector<32x96xf32>, vector<8x96xf32> -> vector<8x96xf32>
    %c0_13 = arith.constant 0 : index
    %c0_14 = arith.constant 0 : index
    %34 = vector.load %arg6[%c0_13, %c0_14] : memref<1x96xf32, #tpu.memory_space<vmem>>, vector<1x96xf32>
    %35 = vector.shape_cast %34 : vector<1x96xf32> to vector<96xf32>
    %36 = vector.shape_cast %35 : vector<96xf32> to vector<1x96xf32>
    %37 = vector.broadcast %36 : vector<1x96xf32> to vector<8x96xf32>
    %38 = arith.addf %33, %37 : vector<8x96xf32>
    %39 = vector.extract_strided_slice %38 {offsets = [0, 0], sizes = [8, 8], strides = [1, 1]} : vector<8x96xf32> to vector<8x8xf32>
    %c0_15 = arith.constant 0 : index
    %c0_16 = arith.constant 0 : index
    %c0_17 = arith.constant 0 : index
    %40 = vector.load %arg17[%c0_15, %c0_16, %c0_17] : memref<4x8x8xf32, #tpu.memory_space<vmem>>, vector<1x8x8xf32>
    %41 = vector.shape_cast %40 : vector<1x8x8xf32> to vector<8x8xf32>
    %42 = vector.shape_cast %39 : vector<8x8xf32> to vector<1x8x8xf32>
    tpu.vector_store %arg17[%c0_15, %c0_16, %c0_17], %42 {strides = array<i32>} : memref<4x8x8xf32, #tpu.memory_space<vmem>>, vector<1x8x8xf32>,
    %43 = vector.extract_strided_slice %38 {offsets = [0, 32], sizes = [8, 8], strides = [1, 1]} : vector<8x96xf32> to vector<8x8xf32>
    %c0_18 = arith.constant 0 : index
    %44 = arith.index_cast %1 : i32 to index
    %c0_19 = arith.constant 0 : index
    %45 = vector.load %arg18[%c0_18, %44, %c0_19] : memref<4x8x8xf32, #tpu.memory_space<vmem>>, vector<1x8x8xf32>
    %46 = vector.shape_cast %45 : vector<1x8x8xf32> to vector<8x8xf32>
    %47 = vector.shape_cast %43 : vector<8x8xf32> to vector<1x8x8xf32>
    tpu.vector_store %arg18[%c0_18, %44, %c0_19], %47 {strides = array<i32>} : memref<4x8x8xf32, #tpu.memory_space<vmem>>, vector<1x8x8xf32>,
    %48 = vector.extract_strided_slice %38 {offsets = [0, 64], sizes = [8, 8], strides = [1, 1]} : vector<8x96xf32> to vector<8x8xf32>
    %c0_20 = arith.constant 0 : index
    %49 = arith.index_cast %1 : i32 to index
    %c0_21 = arith.constant 0 : index
    %50 = vector.load %arg19[%c0_20, %49, %c0_21] : memref<4x8x8xf32, #tpu.memory_space<vmem>>, vector<1x8x8xf32>
    %51 = vector.shape_cast %50 : vector<1x8x8xf32> to vector<8x8xf32>
    %52 = vector.shape_cast %48 : vector<8x8xf32> to vector<1x8x8xf32>
    tpu.vector_store %arg19[%c0_20, %49, %c0_21], %52 {strides = array<i32>} : memref<4x8x8xf32, #tpu.memory_space<vmem>>, vector<1x8x8xf32>,
    %53 = vector.extract_strided_slice %38 {offsets = [0, 8], sizes = [8, 8], strides = [1, 1]} : vector<8x96xf32> to vector<8x8xf32>
    %c1 = arith.constant 1 : index
    %c0_22 = arith.constant 0 : index
    %c0_23 = arith.constant 0 : index
    %54 = vector.load %arg17[%c1, %c0_22, %c0_23] : memref<4x8x8xf32, #tpu.memory_space<vmem>>, vector<1x8x8xf32>
    %55 = vector.shape_cast %54 : vector<1x8x8xf32> to vector<8x8xf32>
    %56 = vector.shape_cast %53 : vector<8x8xf32> to vector<1x8x8xf32>
    tpu.vector_store %arg17[%c1, %c0_22, %c0_23], %56 {strides = array<i32>} : memref<4x8x8xf32, #tpu.memory_space<vmem>>, vector<1x8x8xf32>,
    %57 = vector.extract_strided_slice %38 {offsets = [0, 40], sizes = [8, 8], strides = [1, 1]} : vector<8x96xf32> to vector<8x8xf32>
    %c1_24 = arith.constant 1 : index
    %58 = arith.index_cast %1 : i32 to index
    %c0_25 = arith.constant 0 : index
    %59 = vector.load %arg18[%c1_24, %58, %c0_25] : memref<4x8x8xf32, #tpu.memory_space<vmem>>, vector<1x8x8xf32>
    %60 = vector.shape_cast %59 : vector<1x8x8xf32> to vector<8x8xf32>
    %61 = vector.shape_cast %57 : vector<8x8xf32> to vector<1x8x8xf32>
    tpu.vector_store %arg18[%c1_24, %58, %c0_25], %61 {strides = array<i32>} : memref<4x8x8xf32, #tpu.memory_space<vmem>>, vector<1x8x8xf32>,
    %62 = vector.extract_strided_slice %38 {offsets = [0, 72], sizes = [8, 8], strides = [1, 1]} : vector<8x96xf32> to vector<8x8xf32>
    %c1_26 = arith.constant 1 : index
    %63 = arith.index_cast %1 : i32 to index
    %c0_27 = arith.constant 0 : index
    %64 = vector.load %arg19[%c1_26, %63, %c0_27] : memref<4x8x8xf32, #tpu.memory_space<vmem>>, vector<1x8x8xf32>
    %65 = vector.shape_cast %64 : vector<1x8x8xf32> to vector<8x8xf32>
    %66 = vector.shape_cast %62 : vector<8x8xf32> to vector<1x8x8xf32>
    tpu.vector_store %arg19[%c1_26, %63, %c0_27], %66 {strides = array<i32>} : memref<4x8x8xf32, #tpu.memory_space<vmem>>, vector<1x8x8xf32>,
    %67 = vector.extract_strided_slice %38 {offsets = [0, 16], sizes = [8, 8], strides = [1, 1]} : vector<8x96xf32> to vector<8x8xf32>
    %c2 = arith.constant 2 : index
    %c0_28 = arith.constant 0 : index
    %c0_29 = arith.constant 0 : index
    %68 = vector.load %arg17[%c2, %c0_28, %c0_29] : memref<4x8x8xf32, #tpu.memory_space<vmem>>, vector<1x8x8xf32>
    %69 = vector.shape_cast %68 : vector<1x8x8xf32> to vector<8x8xf32>
    %70 = vector.shape_cast %67 : vector<8x8xf32> to vector<1x8x8xf32>
    tpu.vector_store %arg17[%c2, %c0_28, %c0_29], %70 {strides = array<i32>} : memref<4x8x8xf32, #tpu.memory_space<vmem>>, vector<1x8x8xf32>,
    %71 = vector.extract_strided_slice %38 {offsets = [0, 48], sizes = [8, 8], strides = [1, 1]} : vector<8x96xf32> to vector<8x8xf32>
    %c2_30 = arith.constant 2 : index
    %72 = arith.index_cast %1 : i32 to index
    %c0_31 = arith.constant 0 : index
    %73 = vector.load %arg18[%c2_30, %72, %c0_31] : memref<4x8x8xf32, #tpu.memory_space<vmem>>, vector<1x8x8xf32>
    %74 = vector.shape_cast %73 : vector<1x8x8xf32> to vector<8x8xf32>
    %75 = vector.shape_cast %71 : vector<8x8xf32> to vector<1x8x8xf32>
    tpu.vector_store %arg18[%c2_30, %72, %c0_31], %75 {strides = array<i32>} : memref<4x8x8xf32, #tpu.memory_space<vmem>>, vector<1x8x8xf32>,
    %76 = vector.extract_strided_slice %38 {offsets = [0, 80], sizes = [8, 8], strides = [1, 1]} : vector<8x96xf32> to vector<8x8xf32>
    %c2_32 = arith.constant 2 : index
    %77 = arith.index_cast %1 : i32 to index
    %c0_33 = arith.constant 0 : index
    %78 = vector.load %arg19[%c2_32, %77, %c0_33] : memref<4x8x8xf32, #tpu.memory_space<vmem>>, vector<1x8x8xf32>
    %79 = vector.shape_cast %78 : vector<1x8x8xf32> to vector<8x8xf32>
    %80 = vector.shape_cast %76 : vector<8x8xf32> to vector<1x8x8xf32>
    tpu.vector_store %arg19[%c2_32, %77, %c0_33], %80 {strides = array<i32>} : memref<4x8x8xf32, #tpu.memory_space<vmem>>, vector<1x8x8xf32>,
    %81 = vector.extract_strided_slice %38 {offsets = [0, 24], sizes = [8, 8], strides = [1, 1]} : vector<8x96xf32> to vector<8x8xf32>
    %c3 = arith.constant 3 : index
    %c0_34 = arith.constant 0 : index
    %c0_35 = arith.constant 0 : index
    %82 = vector.load %arg17[%c3, %c0_34, %c0_35] : memref<4x8x8xf32, #tpu.memory_space<vmem>>, vector<1x8x8xf32>
    %83 = vector.shape_cast %82 : vector<1x8x8xf32> to vector<8x8xf32>
    %84 = vector.shape_cast %81 : vector<8x8xf32> to vector<1x8x8xf32>
    tpu.vector_store %arg17[%c3, %c0_34, %c0_35], %84 {strides = array<i32>} : memref<4x8x8xf32, #tpu.memory_space<vmem>>, vector<1x8x8xf32>,
    %85 = vector.extract_strided_slice %38 {offsets = [0, 56], sizes = [8, 8], strides = [1, 1]} : vector<8x96xf32> to vector<8x8xf32>
    %c3_36 = arith.constant 3 : index
    %86 = arith.index_cast %1 : i32 to index
    %c0_37 = arith.constant 0 : index
    %87 = vector.load %arg18[%c3_36, %86, %c0_37] : memref<4x8x8xf32, #tpu.memory_space<vmem>>, vector<1x8x8xf32>
    %88 = vector.shape_cast %87 : vector<1x8x8xf32> to vector<8x8xf32>
    %89 = vector.shape_cast %85 : vector<8x8xf32> to vector<1x8x8xf32>
    tpu.vector_store %arg18[%c3_36, %86, %c0_37], %89 {strides = array<i32>} : memref<4x8x8xf32, #tpu.memory_space<vmem>>, vector<1x8x8xf32>,
    %90 = vector.extract_strided_slice %38 {offsets = [0, 88], sizes = [8, 8], strides = [1, 1]} : vector<8x96xf32> to vector<8x8xf32>
    %c3_38 = arith.constant 3 : index
    %91 = arith.index_cast %1 : i32 to index
    %c0_39 = arith.constant 0 : index
    %92 = vector.load %arg19[%c3_38, %91, %c0_39] : memref<4x8x8xf32, #tpu.memory_space<vmem>>, vector<1x8x8xf32>
    %93 = vector.shape_cast %92 : vector<1x8x8xf32> to vector<8x8xf32>
    %94 = vector.shape_cast %90 : vector<8x8xf32> to vector<1x8x8xf32>
    tpu.vector_store %arg19[%c3_38, %91, %c0_39], %94 {strides = array<i32>} : memref<4x8x8xf32, #tpu.memory_space<vmem>>, vector<1x8x8xf32>,
    %c0_40 = arith.constant 0 : index
    %c0_41 = arith.constant 0 : index
    %c0_42 = arith.constant 0 : index
    %95 = vector.load %arg17[%c0_40, %c0_41, %c0_42] : memref<4x8x8xf32, #tpu.memory_space<vmem>>, vector<4x8x8xf32>
    %96 = tpu.iota {dimensions = array<i32: 0>} : vector<8x1xi32>
    %97 = vector.broadcast %1 : i32 to vector<8x1xi32>
    %98 = arith.addi %97, %96 : vector<8x1xi32>
    %c1_i32 = arith.constant 1 : i32
    %99 = arith.addi %arg1, %c1_i32 : i32
    %cst_43 = arith.constant -1.000000e+30 : f32
    %100 = vector.broadcast %cst_43 : f32 to vector<4x8x1xf32>
    %cst_44 = arith.constant -1.000000e+30 : f32
    %c0_i32 = arith.constant 0 : i32
    %101 = arith.subi %99, %c0_i32 : i32
    %102 = arith.addi %c0_i32, %101 : i32
    %c1_i32_45 = arith.constant 1 : i32
    %103 = scf.for %arg21 = %c0_i32 to %102 step %c1_i32_45 iter_args(%arg22 = %100) -> (vector<4x8x1xf32>)  : i32 {
      %c8_i32_105 = arith.constant 8 : i32
      %216 = arith.muli %arg21, %c8_i32_105 : i32
      %217 = tpu.assume_multiple %216, 8 : i32
      %c0_106 = arith.constant 0 : index
      %218 = arith.index_cast %217 : i32 to index
      %c0_107 = arith.constant 0 : index
      %219 = vector.load %arg18[%c0_106, %218, %c0_107] : memref<4x8x8xf32, #tpu.memory_space<vmem>>, vector<4x8x8xf32>
      "tpu.trace_start"() <{level = 10 : i32, message = "hqd,hkd->hqk"}> : () -> ()
      %cst_108 = arith.constant dense<0.000000e+00> : vector<4x8x8xf32>
      %220 = tpu.matmul %95, %219, %cst_108 {dimension_numbers = #tpu.dot_dimension_numbers<[2], [2], [1], [1], [0, 0, 0, 1, 1, 1], [0], [0]>} : vector<4x8x8xf32>, vector<4x8x8xf32>, vector<4x8x8xf32> -> vector<4x8x8xf32>
      "tpu.trace_stop"() : () -> ()
      %cst_109 = arith.constant 0.353553385 : f32
      %221 = vector.broadcast %cst_109 : f32 to vector<4x8x8xf32>
      %222 = arith.mulf %220, %221 : vector<4x8x8xf32>
      %223 = tpu.iota {dimensions = array<i32: 1>} : vector<1x8xi32>
      %224 = vector.broadcast %217 : i32 to vector<1x8xi32>
      %225 = arith.addi %224, %223 : vector<1x8xi32>
      %226 = vector.broadcast %98 : vector<8x1xi32> to vector<8x8xi32>
      %227 = vector.broadcast %225 : vector<1x8xi32> to vector<8x8xi32>
      %228 = arith.cmpi sge, %226, %227 : vector<8x8xi32>
      %229 = vector.shape_cast %228 : vector<8x8xi1> to vector<1x8x8xi1>
      %230 = vector.shape_cast %229 : vector<1x8x8xi1> to vector<1x8x8xi1>
      %231 = vector.broadcast %230 : vector<1x8x8xi1> to vector<4x8x8xi1>
      %232 = vector.broadcast %cst_44 : f32 to vector<4x8x8xf32>
      %233 = arith.select %231, %222, %232 : vector<4x8x8xi1>, vector<4x8x8xf32>
      %234 = arith.index_cast %arg21 : i32 to index
      %c0_110 = arith.constant 0 : index
      %c0_111 = arith.constant 0 : index
      %c0_112 = arith.constant 0 : index
      %235 = vector.load %arg20[%234, %c0_110, %c0_111, %c0_112] : memref<1x4x8x8xf32, #tpu.memory_space<vmem>>, vector<1x4x8x8xf32>
      %236 = vector.shape_cast %235 : vector<1x4x8x8xf32> to vector<4x8x8xf32>
      %237 = vector.shape_cast %233 : vector<4x8x8xf32> to vector<1x4x8x8xf32>
      tpu.vector_store %arg20[%234, %c0_110, %c0_111, %c0_112], %237 {strides = array<i32>} : memref<1x4x8x8xf32, #tpu.memory_space<vmem>>, vector<1x4x8x8xf32>,
      %cst_113 = arith.constant dense<0xFF800000> : vector<4x8xf32>
      %238 = vector.multi_reduction <maximumf>, %233, %cst_113 [2] : vector<4x8x8xf32> to vector<4x8xf32>
      %239 = vector.shape_cast %238 : vector<4x8xf32> to vector<4x8x1xf32>
      %240 = arith.maximumf %arg22, %239 : vector<4x8x1xf32>
      scf.yield %240 : vector<4x8x1xf32>
    }
    %c1_i32_46 = arith.constant 1 : i32
    %104 = arith.addi %arg1, %c1_i32_46 : i32
    %cst_47 = arith.constant 0.000000e+00 : f32
    %105 = vector.broadcast %cst_47 : f32 to vector<4x8x1xf32>
    %cst_48 = arith.constant 0.000000e+00 : f32
    %106 = vector.broadcast %cst_48 : f32 to vector<4x8x8xf32>
    %c0_i32_49 = arith.constant 0 : i32
    %107 = arith.subi %104, %c0_i32_49 : i32
    %108 = arith.addi %c0_i32_49, %107 : i32
    %c1_i32_50 = arith.constant 1 : i32
    %109:2 = scf.for %arg21 = %c0_i32_49 to %108 step %c1_i32_50 iter_args(%arg22 = %105, %arg23 = %106) -> (vector<4x8x1xf32>, vector<4x8x8xf32>)  : i32 {
      %216 = arith.index_cast %arg21 : i32 to index
      %c0_105 = arith.constant 0 : index
      %c0_106 = arith.constant 0 : index
      %c0_107 = arith.constant 0 : index
      %217 = vector.load %arg20[%216, %c0_105, %c0_106, %c0_107] : memref<1x4x8x8xf32, #tpu.memory_space<vmem>>, vector<1x4x8x8xf32>
      %218 = vector.shape_cast %217 : vector<1x4x8x8xf32> to vector<4x8x8xf32>
      %219 = vector.broadcast %103 : vector<4x8x1xf32> to vector<4x8x8xf32>
      %220 = arith.subf %218, %219 : vector<4x8x8xf32>
      %221 = math.exp %220 : vector<4x8x8xf32>
      %222 = arith.index_cast %arg21 : i32 to index
      %c0_108 = arith.constant 0 : index
      %c0_109 = arith.constant 0 : index
      %c0_110 = arith.constant 0 : index
      %223 = vector.load %arg20[%222, %c0_108, %c0_109, %c0_110] : memref<1x4x8x8xf32, #tpu.memory_space<vmem>>, vector<1x4x8x8xf32>
      %224 = vector.shape_cast %223 : vector<1x4x8x8xf32> to vector<4x8x8xf32>
      %225 = vector.shape_cast %221 : vector<4x8x8xf32> to vector<1x4x8x8xf32>
      tpu.vector_store %arg20[%222, %c0_108, %c0_109, %c0_110], %225 {strides = array<i32>} : memref<1x4x8x8xf32, #tpu.memory_space<vmem>>, vector<1x4x8x8xf32>,
      %cst_111 = arith.constant dense<0.000000e+00> : vector<4x8xf32>
      %226 = vector.multi_reduction <add>, %221, %cst_111 [2] : vector<4x8x8xf32> to vector<4x8xf32>
      %227 = vector.shape_cast %226 : vector<4x8xf32> to vector<4x8x1xf32>
      %228 = arith.addf %arg22, %227 : vector<4x8x1xf32>
      %c8_i32_112 = arith.constant 8 : i32
      %229 = arith.muli %arg21, %c8_i32_112 : i32
      %230 = tpu.assume_multiple %229, 8 : i32
      %c0_113 = arith.constant 0 : index
      %231 = arith.index_cast %230 : i32 to index
      %c0_114 = arith.constant 0 : index
      %232 = vector.load %arg19[%c0_113, %231, %c0_114] : memref<4x8x8xf32, #tpu.memory_space<vmem>>, vector<4x8x8xf32>
      "tpu.trace_start"() <{level = 10 : i32, message = "hqk,hkd->hqd"}> : () -> ()
      %cst_115 = arith.constant dense<0.000000e+00> : vector<4x8x8xf32>
      %233 = tpu.matmul %221, %232, %cst_115 {dimension_numbers = #tpu.dot_dimension_numbers<[2], [1], [1], [2], [0, 0, 0, 1, 1, 2], [0], [0]>} : vector<4x8x8xf32>, vector<4x8x8xf32>, vector<4x8x8xf32> -> vector<4x8x8xf32>
      "tpu.trace_stop"() : () -> ()
      %234 = arith.addf %arg23, %233 : vector<4x8x8xf32>
      scf.yield %228, %234 : vector<4x8x1xf32>, vector<4x8x8xf32>
    }
    %cst_51 = arith.constant 1.000000e+00 : f32
    %110 = vector.broadcast %cst_51 : f32 to vector<4x8x1xf32>
    %111 = arith.divf %110, %109#0 : vector<4x8x1xf32>
    %c0_52 = arith.constant 0 : index
    %c0_53 = arith.constant 0 : index
    %c0_54 = arith.constant 0 : index
    %c0_55 = arith.constant 0 : index
    %112 = vector.load %arg20[%c0_52, %c0_53, %c0_54, %c0_55] : memref<1x4x8x8xf32, #tpu.memory_space<vmem>>, vector<1x4x8x8xf32>
    %113 = vector.shape_cast %112 : vector<1x4x8x8xf32> to vector<4x8x8xf32>
    %114 = tpu.iota {dimensions = array<i32: 1>} : vector<1x8xi32>
    %115 = vector.broadcast %98 : vector<8x1xi32> to vector<8x8xi32>
    %116 = vector.broadcast %114 : vector<1x8xi32> to vector<8x8xi32>
    %117 = arith.cmpi sge, %115, %116 : vector<8x8xi32>
    %118 = vector.shape_cast %117 : vector<8x8xi1> to vector<1x8x8xi1>
    %119 = vector.broadcast %111 : vector<4x8x1xf32> to vector<4x8x8xf32>
    %120 = arith.mulf %113, %119 : vector<4x8x8xf32>
    %cst_56 = arith.constant 0.000000e+00 : f32
    %121 = vector.shape_cast %118 : vector<1x8x8xi1> to vector<1x8x8xi1>
    %122 = vector.broadcast %121 : vector<1x8x8xi1> to vector<4x8x8xi1>
    %123 = vector.broadcast %cst_56 : f32 to vector<4x8x8xf32>
    %124 = arith.select %122, %120, %123 : vector<4x8x8xi1>, vector<4x8x8xf32>
    %c0_57 = arith.constant 0 : index
    %c0_58 = arith.constant 0 : index
    %c0_59 = arith.constant 0 : index
    %c0_60 = arith.constant 0 : index
    %125 = vector.load %arg16[%c0_57, %c0_58, %c0_59, %c0_60] : memref<1x4x8x8xf32, #tpu.memory_space<vmem>>, vector<1x4x8x8xf32>
    %126 = vector.shape_cast %125 : vector<1x4x8x8xf32> to vector<4x8x8xf32>
    %127 = vector.shape_cast %124 : vector<4x8x8xf32> to vector<1x4x8x8xf32>
    tpu.vector_store %arg16[%c0_57, %c0_58, %c0_59, %c0_60], %127 {strides = array<i32>} : memref<1x4x8x8xf32, #tpu.memory_space<vmem>>, vector<1x4x8x8xf32>,
    %128 = vector.broadcast %111 : vector<4x8x1xf32> to vector<4x8x8xf32>
    %129 = arith.mulf %109#1, %128 : vector<4x8x8xf32>
    %cst_61 = arith.constant 0.000000e+00 : f32
    %130 = vector.broadcast %cst_61 : f32 to vector<8x32xf32>
    %131 = vector.extract_strided_slice %129 {offsets = [0, 0, 0], sizes = [1, 8, 8], strides = [1, 1, 1]} : vector<4x8x8xf32> to vector<1x8x8xf32>
    %132 = vector.shape_cast %131 : vector<1x8x8xf32> to vector<8x8xf32>
    %c0_62 = arith.constant 0 : index
    %c0_63 = arith.constant 0 : index
    %c0_64 = arith.constant 0 : index
    %133 = vector.load %arg7[%c0_62, %c0_63, %c0_64] : memref<4x8x32xf32, #tpu.memory_space<vmem>>, vector<1x8x32xf32>
    %134 = vector.shape_cast %133 : vector<1x8x32xf32> to vector<8x32xf32>
    %cst_65 = arith.constant dense<0.000000e+00> : vector<8x32xf32>
    %135 = tpu.matmul %132, %134, %cst_65 {dimension_numbers = #tpu.dot_dimension_numbers<[1], [0], [0], [1], [0, 0, 1, 1], [], []>} : vector<8x8xf32>, vector<8x32xf32>, vector<8x32xf32> -> vector<8x32xf32>
    %136 = arith.addf %130, %135 : vector<8x32xf32>
    %137 = vector.extract_strided_slice %129 {offsets = [1, 0, 0], sizes = [1, 8, 8], strides = [1, 1, 1]} : vector<4x8x8xf32> to vector<1x8x8xf32>
    %138 = vector.shape_cast %137 : vector<1x8x8xf32> to vector<8x8xf32>
    %c1_66 = arith.constant 1 : index
    %c0_67 = arith.constant 0 : index
    %c0_68 = arith.constant 0 : index
    %139 = vector.load %arg7[%c1_66, %c0_67, %c0_68] : memref<4x8x32xf32, #tpu.memory_space<vmem>>, vector<1x8x32xf32>
    %140 = vector.shape_cast %139 : vector<1x8x32xf32> to vector<8x32xf32>
    %cst_69 = arith.constant dense<0.000000e+00> : vector<8x32xf32>
    %141 = tpu.matmul %138, %140, %cst_69 {dimension_numbers = #tpu.dot_dimension_numbers<[1], [0], [0], [1], [0, 0, 1, 1], [], []>} : vector<8x8xf32>, vector<8x32xf32>, vector<8x32xf32> -> vector<8x32xf32>
    %142 = arith.addf %136, %141 : vector<8x32xf32>
    %143 = vector.extract_strided_slice %129 {offsets = [2, 0, 0], sizes = [1, 8, 8], strides = [1, 1, 1]} : vector<4x8x8xf32> to vector<1x8x8xf32>
    %144 = vector.shape_cast %143 : vector<1x8x8xf32> to vector<8x8xf32>
    %c2_70 = arith.constant 2 : index
    %c0_71 = arith.constant 0 : index
    %c0_72 = arith.constant 0 : index
    %145 = vector.load %arg7[%c2_70, %c0_71, %c0_72] : memref<4x8x32xf32, #tpu.memory_space<vmem>>, vector<1x8x32xf32>
    %146 = vector.shape_cast %145 : vector<1x8x32xf32> to vector<8x32xf32>
    %cst_73 = arith.constant dense<0.000000e+00> : vector<8x32xf32>
    %147 = tpu.matmul %144, %146, %cst_73 {dimension_numbers = #tpu.dot_dimension_numbers<[1], [0], [0], [1], [0, 0, 1, 1], [], []>} : vector<8x8xf32>, vector<8x32xf32>, vector<8x32xf32> -> vector<8x32xf32>
    %148 = arith.addf %142, %147 : vector<8x32xf32>
    %149 = vector.extract_strided_slice %129 {offsets = [3, 0, 0], sizes = [1, 8, 8], strides = [1, 1, 1]} : vector<4x8x8xf32> to vector<1x8x8xf32>
    %150 = vector.shape_cast %149 : vector<1x8x8xf32> to vector<8x8xf32>
    %c3_74 = arith.constant 3 : index
    %c0_75 = arith.constant 0 : index
    %c0_76 = arith.constant 0 : index
    %151 = vector.load %arg7[%c3_74, %c0_75, %c0_76] : memref<4x8x32xf32, #tpu.memory_space<vmem>>, vector<1x8x32xf32>
    %152 = vector.shape_cast %151 : vector<1x8x32xf32> to vector<8x32xf32>
    %cst_77 = arith.constant dense<0.000000e+00> : vector<8x32xf32>
    %153 = tpu.matmul %150, %152, %cst_77 {dimension_numbers = #tpu.dot_dimension_numbers<[1], [0], [0], [1], [0, 0, 1, 1], [], []>} : vector<8x8xf32>, vector<8x32xf32>, vector<8x32xf32> -> vector<8x32xf32>
    %154 = arith.addf %148, %153 : vector<8x32xf32>
    %c0_78 = arith.constant 0 : index
    %c0_79 = arith.constant 0 : index
    %155 = vector.load %arg8[%c0_78, %c0_79] : memref<1x32xf32, #tpu.memory_space<vmem>>, vector<1x32xf32>
    %156 = vector.shape_cast %155 : vector<1x32xf32> to vector<32xf32>
    %157 = vector.shape_cast %156 : vector<32xf32> to vector<1x32xf32>
    %158 = vector.broadcast %157 : vector<1x32xf32> to vector<8x32xf32>
    %159 = arith.addf %154, %158 : vector<8x32xf32>
    %160 = arith.addf %3, %159 : vector<8x32xf32>
    %c0_80 = arith.constant 0 : index
    %c0_81 = arith.constant 0 : index
    %161 = vector.load %arg9[%c0_80, %c0_81] : memref<1x32xf32, #tpu.memory_space<vmem>>, vector<1x32xf32>
    %162 = vector.shape_cast %161 : vector<1x32xf32> to vector<32xf32>
    %c0_82 = arith.constant 0 : index
    %c0_83 = arith.constant 0 : index
    %163 = vector.load %arg10[%c0_82, %c0_83] : memref<1x32xf32, #tpu.memory_space<vmem>>, vector<1x32xf32>
    %164 = vector.shape_cast %163 : vector<1x32xf32> to vector<32xf32>
    %cst_84 = arith.constant dense<0.000000e+00> : vector<8xf32>
    %165 = vector.multi_reduction <add>, %160, %cst_84 [1] : vector<8x32xf32> to vector<8xf32>
    %166 = vector.shape_cast %165 : vector<8xf32> to vector<8x1xf32>
    %cst_85 = arith.constant 3.200000e+01 : f32
    %167 = vector.broadcast %cst_85 : f32 to vector<8x1xf32>
    %168 = arith.divf %166, %167 : vector<8x1xf32>
    %169 = vector.broadcast %168 : vector<8x1xf32> to vector<8x32xf32>
    %170 = arith.subf %160, %169 : vector<8x32xf32>
    %171 = arith.mulf %170, %170 : vector<8x32xf32>
    %cst_86 = arith.constant dense<0.000000e+00> : vector<8xf32>
    %172 = vector.multi_reduction <add>, %171, %cst_86 [1] : vector<8x32xf32> to vector<8xf32>
    %173 = vector.shape_cast %172 : vector<8xf32> to vector<8x1xf32>
    %cst_87 = arith.constant 3.200000e+01 : f32
    %174 = vector.broadcast %cst_87 : f32 to vector<8x1xf32>
    %175 = arith.divf %173, %174 : vector<8x1xf32>
    %176 = vector.broadcast %168 : vector<8x1xf32> to vector<8x32xf32>
    %177 = arith.subf %160, %176 : vector<8x32xf32>
    %cst_88 = arith.constant 9.99999974E-6 : f32
    %178 = vector.broadcast %cst_88 : f32 to vector<8x1xf32>
    %179 = arith.addf %175, %178 : vector<8x1xf32>
    %180 = math.rsqrt %179 : vector<8x1xf32>
    %181 = vector.broadcast %180 : vector<8x1xf32> to vector<8x32xf32>
    %182 = arith.mulf %177, %181 : vector<8x32xf32>
    %183 = vector.shape_cast %162 : vector<32xf32> to vector<1x32xf32>
    %184 = vector.broadcast %183 : vector<1x32xf32> to vector<8x32xf32>
    %185 = arith.mulf %182, %184 : vector<8x32xf32>
    %186 = vector.shape_cast %164 : vector<32xf32> to vector<1x32xf32>
    %187 = vector.broadcast %186 : vector<1x32xf32> to vector<8x32xf32>
    %188 = arith.addf %185, %187 : vector<8x32xf32>
    %c0_89 = arith.constant 0 : index
    %c0_90 = arith.constant 0 : index
    %189 = vector.load %arg11[%c0_89, %c0_90] : memref<32x128xf32, #tpu.memory_space<vmem>>, vector<32x128xf32>
    %cst_91 = arith.constant dense<0.000000e+00> : vector<8x128xf32>
    %190 = tpu.matmul %188, %189, %cst_91 {dimension_numbers = #tpu.dot_dimension_numbers<[1], [0], [0], [1], [0, 0, 1, 1], [], []>} : vector<8x32xf32>, vector<32x128xf32>, vector<8x128xf32> -> vector<8x128xf32>
    %c0_92 = arith.constant 0 : index
    %c0_93 = arith.constant 0 : index
    %191 = vector.load %arg12[%c0_92, %c0_93] : memref<1x128xf32, #tpu.memory_space<vmem>>, vector<1x128xf32>
    %192 = vector.shape_cast %191 : vector<1x128xf32> to vector<128xf32>
    %193 = vector.shape_cast %192 : vector<128xf32> to vector<1x128xf32>
    %194 = vector.broadcast %193 : vector<1x128xf32> to vector<8x128xf32>
    %195 = arith.addf %190, %194 : vector<8x128xf32>
    %cst_94 = arith.constant 5.000000e-01 : f32
    %196 = vector.broadcast %cst_94 : f32 to vector<8x128xf32>
    %197 = arith.mulf %196, %195 : vector<8x128xf32>
    %cst_95 = arith.constant 2.000000e+00 : f32
    %198 = math.sqrt %cst_95 : f32
    %199 = vector.broadcast %198 : f32 to vector<8x128xf32>
    %200 = arith.divf %195, %199 : vector<8x128xf32>
    %201 = math.erf %200 : vector<8x128xf32>
    %cst_96 = arith.constant 1.000000e+00 : f32
    %202 = vector.broadcast %cst_96 : f32 to vector<8x128xf32>
    %203 = arith.addf %202, %201 : vector<8x128xf32>
    %204 = arith.mulf %197, %203 : vector<8x128xf32>
    %c0_97 = arith.constant 0 : index
    %c0_98 = arith.constant 0 : index
    %205 = vector.load %arg13[%c0_97, %c0_98] : memref<128x32xf32, #tpu.memory_space<vmem>>, vector<128x32xf32>
    %cst_99 = arith.constant dense<0.000000e+00> : vector<8x32xf32>
    %206 = tpu.matmul %204, %205, %cst_99 {dimension_numbers = #tpu.dot_dimension_numbers<[1], [0], [0], [1], [0, 0, 1, 1], [], []>} : vector<8x128xf32>, vector<128x32xf32>, vector<8x32xf32> -> vector<8x32xf32>
    %c0_100 = arith.constant 0 : index
    %c0_101 = arith.constant 0 : index
    %207 = vector.load %arg14[%c0_100, %c0_101] : memref<1x32xf32, #tpu.memory_space<vmem>>, vector<1x32xf32>
    %208 = vector.shape_cast %207 : vector<1x32xf32> to vector<32xf32>
    %209 = vector.shape_cast %208 : vector<32xf32> to vector<1x32xf32>
    %210 = vector.broadcast %209 : vector<1x32xf32> to vector<8x32xf32>
    %211 = arith.addf %206, %210 : vector<8x32xf32>
    %212 = arith.addf %160, %211 : vector<8x32xf32>
    %c0_102 = arith.constant 0 : index
    %c0_103 = arith.constant 0 : index
    %c0_104 = arith.constant 0 : index
    %213 = vector.load %arg15[%c0_102, %c0_103, %c0_104] : memref<1x8x32xf32, #tpu.memory_space<vmem>>, vector<1x8x32xf32>
    %214 = vector.shape_cast %213 : vector<1x8x32xf32> to vector<8x32xf32>
    %215 = vector.shape_cast %212 : vector<8x32xf32> to vector<1x8x32xf32>
    tpu.vector_store %arg15[%c0_102, %c0_103, %c0_104], %215 {strides = array<i32>} : memref<1x8x32xf32, #tpu.memory_space<vmem>>, vector<1x8x32xf32>,
    return
  }
  func.func @transform_0(%arg0: i32, %arg1: i32) -> (i32, i32, i32) {
    %c0_i32 = arith.constant 0 : i32
    %c0_i32_0 = arith.constant 0 : i32
    return %arg0, %arg1, %c0_i32 : i32, i32, i32
  }
  func.func @transform_1(%arg0: i32, %arg1: i32) -> (i32, i32) {
    %c0_i32 = arith.constant 0 : i32
    %c0_i32_0 = arith.constant 0 : i32
    %c0_i32_1 = arith.constant 0 : i32
    return %c0_i32, %c0_i32_0 : i32, i32
  }
  func.func @transform_2(%arg0: i32, %arg1: i32) -> (i32, i32) {
    %c0_i32 = arith.constant 0 : i32
    %c0_i32_0 = arith.constant 0 : i32
    %c0_i32_1 = arith.constant 0 : i32
    return %c0_i32, %c0_i32_0 : i32, i32
  }
  func.func @transform_3(%arg0: i32, %arg1: i32) -> (i32, i32) {
    %c0_i32 = arith.constant 0 : i32
    %c0_i32_0 = arith.constant 0 : i32
    %c0_i32_1 = arith.constant 0 : i32
    return %c0_i32, %c0_i32_0 : i32, i32
  }
  func.func @transform_4(%arg0: i32, %arg1: i32) -> (i32, i32) {
    %c0_i32 = arith.constant 0 : i32
    %c0_i32_0 = arith.constant 0 : i32
    %c0_i32_1 = arith.constant 0 : i32
    return %c0_i32, %c0_i32_0 : i32, i32
  }
  func.func @transform_5(%arg0: i32, %arg1: i32) -> (i32, i32, i32) {
    %c0_i32 = arith.constant 0 : i32
    %c0_i32_0 = arith.constant 0 : i32
    %c0_i32_1 = arith.constant 0 : i32
    %c0_i32_2 = arith.constant 0 : i32
    return %c0_i32, %c0_i32_0, %c0_i32_1 : i32, i32, i32
  }
  func.func @transform_6(%arg0: i32, %arg1: i32) -> (i32, i32) {
    %c0_i32 = arith.constant 0 : i32
    %c0_i32_0 = arith.constant 0 : i32
    %c0_i32_1 = arith.constant 0 : i32
    return %c0_i32, %c0_i32_0 : i32, i32
  }
  func.func @transform_7(%arg0: i32, %arg1: i32) -> (i32, i32) {
    %c0_i32 = arith.constant 0 : i32
    %c0_i32_0 = arith.constant 0 : i32
    %c0_i32_1 = arith.constant 0 : i32
    return %c0_i32, %c0_i32_0 : i32, i32
  }
  func.func @transform_8(%arg0: i32, %arg1: i32) -> (i32, i32) {
    %c0_i32 = arith.constant 0 : i32
    %c0_i32_0 = arith.constant 0 : i32
    %c0_i32_1 = arith.constant 0 : i32
    return %c0_i32, %c0_i32_0 : i32, i32
  }
  func.func @transform_9(%arg0: i32, %arg1: i32) -> (i32, i32) {
    %c0_i32 = arith.constant 0 : i32
    %c0_i32_0 = arith.constant 0 : i32
    %c0_i32_1 = arith.constant 0 : i32
    return %c0_i32, %c0_i32_0 : i32, i32
  }
  func.func @transform_10(%arg0: i32, %arg1: i32) -> (i32, i32) {
    %c0_i32 = arith.constant 0 : i32
    %c0_i32_0 = arith.constant 0 : i32
    %c0_i32_1 = arith.constant 0 : i32
    return %c0_i32, %c0_i32_0 : i32, i32
  }
  func.func @transform_11(%arg0: i32, %arg1: i32) -> (i32, i32) {
    %c0_i32 = arith.constant 0 : i32
    %c0_i32_0 = arith.constant 0 : i32
    %c0_i32_1 = arith.constant 0 : i32
    return %c0_i32, %c0_i32_0 : i32, i32
  }
  func.func @transform_12(%arg0: i32, %arg1: i32) -> (i32, i32) {
    %c0_i32 = arith.constant 0 : i32
    %c0_i32_0 = arith.constant 0 : i32
    %c0_i32_1 = arith.constant 0 : i32
    return %c0_i32, %c0_i32_0 : i32, i32
  }
  func.func @transform_13(%arg0: i32, %arg1: i32) -> (i32, i32, i32) {
    %c0_i32 = arith.constant 0 : i32
    %c0_i32_0 = arith.constant 0 : i32
    return %arg0, %arg1, %c0_i32 : i32, i32, i32
  }
  func.func @transform_14(%arg0: i32, %arg1: i32) -> (i32, i32, i32, i32) {
    %c0_i32 = arith.constant 0 : i32
    %c0_i32_0 = arith.constant 0 : i32
    %c0_i32_1 = arith.constant 0 : i32
    return %arg0, %c0_i32, %arg1, %c0_i32_0 : i32, i32, i32, i32
  }
}

</mosaic_0001>

<bundles_post_ra>
// kernel: tpu_custom_call.1
= control target key start
LH: loop header
LB: loop body
LE: loop exit
PB: predicated region body
PF: predicated region fallthrough
CT: control target
= control target key end

     0   :  { %s3484_s0 = inlined_call_operand.vmem [shape: f32[2,8,32], index: 0, kind: input, shape index: {}]   ;;  %s3485_s1 = inlined_call_operand.vmem [shape: f32[1,32], index: 1, kind: input, shape index: {}]   ;;  %s3486_s2 = inlined_call_operand.vmem [shape: f32[1,32], index: 2, kind: input, shape index: {}]   ;;  %s3487_s3 = inlined_call_operand.vmem [shape: f32[32,96], index: 3, kind: input, shape index: {}]   ;;  %s3488_s4 = inlined_call_operand.vmem [shape: f32[1,96], index: 4, kind: input, shape index: {}]   ;;  %s3489_s5 = inlined_call_operand.vmem [shape: f32[4,8,32], index: 5, kind: input, shape index: {}]   ;;  %s3490_s6 = inlined_call_operand.vmem [shape: f32[1,32], index: 6, kind: input, shape index: {}]   ;;  %s3491_s7 = inlined_call_operand.vmem [shape: f32[1,32], index: 7, kind: input, shape index: {}]   ;;  %s3492_s8 = inlined_call_operand.vmem [shape: f32[1,32], index: 8, kind: input, shape index: {}]   ;;  %s3493_s9 = inlined_call_operand.vmem [shape: f32[32,128], index: 9, kind: input, shape index: {}]   ;;  %s3494_s10 = inlined_call_operand.vmem [shape: f32[1,128], index: 10, kind: input, shape index: {}]   ;;  %s3495_s11 = inlined_call_operand.vmem [shape: f32[128,32], index: 11, kind: input, shape index: {}]   ;;  %s3496_s12 = inlined_call_operand.vmem [shape: f32[1,32], index: 12, kind: input, shape index: {}]   ;;  %s3497_s13 = inlined_call_operand.hbm [shape: f32[2,8,32], index: 13, kind: output, shape index: {0}]   ;;  %s3498_s14 = inlined_call_operand.hbm [shape: f32[2,4,8,8], index: 14, kind: output, shape index: {1}]  }
   0x1   :  { %3500 = sst [smem:[#allocation13_spill]] %s3484_s0 }
   0x2   :  { %3501 = sst [smem:[#allocation14_spill]] %s3485_s1 }
   0x3   :  { %3502 = sst [smem:[#allocation15_spill]] %s3486_s2 }
   0x4   :  { %3503 = sst [smem:[#allocation16_spill]] %s3487_s3 }
   0x5   :  { %3504 = sst [smem:[#allocation17_spill]] %s3488_s4 }
   0x6   :  { %3505 = sst [smem:[#allocation18_spill]] %s3489_s5 }
   0x7   :  { %3506 = sst [smem:[#allocation19_spill]] %s3490_s6 }
   0x8   :  { %3507 = sst [smem:[#allocation20_spill]] %s3491_s7 }
   0x9   :  { %20 = vsyncpa [#allocation7], 0 }
   0xa   :  { %22 = vsyncpa [#allocation7 + $0x1], 0 }
   0xb   :  { %23 = vsyncpa [#allocation9], 0 }
   0xc   :  { %25 = vsyncpa [#allocation9 + $0x1], 0  ;;  %s2926_s29 = smov 0   ;;  %s2928_s30 = smov 0  }
   0xd   :  { %s2930_s15 = smov 0   ;;  %s2932_s16 = smov 0  }
   0xe   :  { %s2934_s17 = smov 0   ;;  %s2936_s18 = smov 0  }
   0xf LB: > { %s2174_s19 = sadd.s32 4294967295, %s2772_s18   ;;  %s2175_s20 = sadd.s32 4294967294, %s2772_s18   ;;  %s2772_s18 = sphi %s2936_s18, %s31_s18   ;;  %s2768_s17 = sphi %s2934_s17, %s3543_s17   ;;  %s2764_s16 = sphi %s2932_s16, %s3542_s16   ;;  %s2760_s15 = sphi %s2930_s15, %s3541_s15   ;;  %s2756_s30 = sphi %s2928_s30, %s3540_s30   ;;  %s2752_s29 = sphi %s2926_s29, %s3539_s29  }
  0x10   : > { %s43_s21 = sadd.s32 1, %s2768_s17  ;;  %s332_s22 = sadd.s32 1, %s2760_s15 }
  0x11   : > { %p45_p0 = scmp.ge.s32.totalorder %s43_s21, 2  ;;  %p342_p1 = scmp.ne.s32.totalorder %s2760_s15, %s2756_s30 }
  0x12   : > { %p343_p2 = scmp.eq.s32.totalorder %s2174_s19, 1  ;;  %p348_p3 = scmp.ne.s32.totalorder %s2756_s30, %s2752_s29 }
  0x13   : > { %s3545_s21 = smov (%p45_p0, %s43_s21), 0  ;;  %p349_p5 = scmp.eq.s32.totalorder %s2175_s20, 1 }
  0x14   : > { %3508 = sst [smem:[#allocation12_spill]] %s3545_s21  ;;  %p2966_p4 = por %p343_p2, %p342_p1 }
  0x15   : > { %s327_s24 = ssub.s32 %s2768_s17, %s3545_s21  ;;  %p2178_p6 = scmp.ge.s32.totalorder %s2772_s18, 1 }
  0x16   : > { %p330_p7 = scmp.eq.s32.totalorder %s327_s24, 0  ;;  %p2973_p8 = por %p349_p5, %p348_p3 }
  0x17   : > { %p441_p9 = scmp.lt.s32.totalorder %s2772_s18, 3 }
  0x18   : > { %s2979_s26 = scalar_select %p330_p7, %s2760_s15, %s332_s22  }
  0x19   : > { %p442_p10 = pnand %p2178_p6, %p441_p9 }
  0x1a   : > { %p494_p11 = scmp.lt.s32.totalorder (!%p442_p10), %s2764_s16, 1  ;;  %s3511_s0 = sld [smem:[#allocation13_spill]] (!%p442_p10) }
  0x1b   : > { %445 = sbr.rel (%p442_p10) target bundleno = 2204 (0x89c), region = 72  ;;  %s2993_s22 = sand.u32 (!%p442_p10), 1, %s2756_s30  }
  0x1c   : > { %s3512_s3 = sld [smem:[#allocation16_spill]] (!%p442_p10)  ;;  %s2833_s20 = smov (!%p442_p10), 120  }
  0x1d   : > { %s3513_s1 = sld [smem:[#allocation14_spill]] (!%p442_p10)  ;;  %s2835_s21 = smov (!%p442_p10), 112  }
  0x1e   : > { %s3514_s2 = sld [smem:[#allocation15_spill]] (!%p442_p10)  ;;  %s2838_s19 = smov (!%p442_p10), 88  }
  0x1f   : > { %s3515_s4 = sld [smem:[#allocation17_spill]] (!%p442_p10) }
  0x20   : > { %s495_s27 = scalar_select %p494_p11, %s2764_s16, 1  ;;  %vm505_vm0 = vcmask 261120   ;;  %v2830_v8 = vmov 0.0   ;;  %vm2831_vm1 = vmmov 0   ;;  %vm618_vm2 = vcmask 64512  }
  0x21   : > { %2280 = vmatprep.subr.mxu0 %v2830_v8  ;;  %2288 = vmatprep.mubr.msk.f32.mxu0 %vm2831_vm1, %v2830_v8  ;;  %v683_v26 = vlaneseq  ;;  %v3056_v42 = vmov -1e+30   ;;  %v3058_v43 = vmov -1e+30   ;;  %v3060_v44 = vmov -1e+30  }
  0x22   : > { %s2181_s28 = sshll.u32 %s495_s27, 3  ;;  %v537_v7 = vld [vmem:[%s3512_s3 + $0x18] sm:$0xff]  ;;  %v536_v9 = vld [vmem:[%s3512_s3 + $0x10] sm:$0xff]  ;;  %v535_v10 = vld [vmem:[%s3512_s3 + $0x8] sm:$0xff]  ;;  %s2836_s27 = smov 96  }
  0x23   : > { %s500_s24 = scalar_lea.vmem %s3511_s0, %s2181_s28  ;;  %2281 = vmatpush3.msra.mxu0 %v537_v7  ;;  %v534_v11 = vld [vmem:[%s3512_s3] sm:$0xff]  ;;  %s2832_s0 = smov 104   ;;  %v3029_v27 = vshrl.u32 %v683_v26, 7  ;;  %v3062_v45 = vmov -1e+30  }
  0x24   : > { %v2986_v0 = vld [vmem:[%s500_s24] sm:$0xff]  ;;  %2282 = vmatprep.subr.mxu0 %v2830_v8  ;;  %s2834_s24 = smov 72   ;;  %s2837_s28 = smov 64  }
  0x25   : > { %v506_v1 = vsel %vm505_vm0, %v2986_v0, 0.0  ;;  %2283 = vmatpush3.msra.mxu0 %v536_v9  ;;  %v2182_v16 = vld [vmem:[%s3513_s1] ss:$0 sm:$0xff]  ;;  %s2841_s1 = smov 48  }
  0x26   : > { %507 = vadd.xlane.f32.xlu0 %v506_v1  ;;  %2284 = vmatprep.subr.mxu0 %v2830_v8  ;;  %v2183_v18 = vld [vmem:[%s3514_s2] ss:$0 sm:$0xff] }
  0x27   : > { %2285 = vmatpush3.msra.mxu0 %v535_v10  ;;  %v2184_v21 = vld [vmem:[%s3515_s4] ss:$0 sm:$0xff] }
  0x28   : > { %2286 = vmatprep.subr.mxu0 %v2830_v8 }
  0x29   : > { %2287 = vmatpush3.msra.mxu0 %v534_v11 }
  0xaf   : > { %v508_v2 = vpop.xlane.xlu0 %507 }
  0xb0   : > { %v510_v3 = vmul.f32 0.03125, %v508_v2 }
  0xb2   : > { %v511_v4 = vsub.f32 %v2986_v0, %v510_v3 }
  0xb4   : > { %v512_v5 = vmul.f32 %v511_v4, %v511_v4 }
  0xb6   : > { %v513_v6 = vsel %vm505_vm0, %v512_v5, 0.0 }
  0xb7   : > { %514 = vadd.xlane.f32.xlu0 %v513_v6 }
 0x140   : > { %v515_v12 = vpop.xlane.xlu0 %514 }
 0x141   : > { %v516_v13 = vmul.f32 0.03125, %v515_v12 }
 0x143   : > { %v517_v14 = vadd.f32 1e-05, %v516_v13 }
 0x145   : > { %2588 = vrsqrt.f32 %v517_v14 }
 0x152   : > { %v2589_v15 = vpop.eup %2588 }
 0x153   : > { %v519_v17 = vmul.f32 %v2589_v15, %v511_v4 }
 0x155   : > { %v526_v19 = vmul.f32 %v2182_v16, %v519_v17 }
 0x157   : > { %v533_v20 = vadd.f32 %v2183_v18, %v526_v19 }
 0x159   : > { %2289 = vmatmul.mubr.msk.f32.vlgmr.msra.gmra.mxu0 %vm505_vm0, %v533_v20 }
 0x219   : > { %v614_v22 = vpop.f32.mrf.mxu0 }
 0x21a   : > { %v615_v23 = vadd.f32 %v2184_v21, %v614_v22 }
 0x21b   : > { %v2290_v24 = vpop.f32.mrf.mxu0 }
 0x21c   : > { %663 = vrot.lane.b32.xlu0 %v615_v23, %s2832_s0  ;;  %631 = vrot.lane.b32.xlu1 %v615_v23, %s2833_s20  ;;  %619 = vst.msk [vmem:[#allocation2] sm:$0xff] %vm618_vm2, %v615_v23  ;;  %s2839_s0 = smov 56   ;;  %s2840_s20 = smov 80  }
 0x220   : > { %668 = vrot.lane.b32.xlu0 %v615_v23, %s2834_s24  ;;  %647 = vrot.lane.b32.xlu1 %v615_v23, %s2835_s21  ;;  %s2842_s24 = smov 40  }
 0x223   : > { %v3026_v25 = vld [vmem:[#allocation2] sm:$0xff] }
 0x224   : > { %621 = vrot.lane.b32.xlu1 %v615_v23, %s2836_s27  ;;  %s3517_s27 = sshll.u32 %s2993_s22, 5 }
 0x228   : > { %626 = vrot.lane.b32.xlu1 %v615_v23, %s2837_s28  ;;  %s3054_s28 = scalar_lea.vmem [#allocation8], %s3517_s27 }
 0x22c   : > { %636 = vrot.lane.b32.xlu1 %v615_v23, %s2838_s19  ;;  %s3064_s19 = smov 0  }
 0x230   : > { %642 = vrot.lane.b32.xlu1 %v615_v23, %s2839_s0 }
 0x234   : > { %652 = vrot.lane.b32.xlu1 %v615_v23, %s2840_s20 }
 0x238   : > { %658 = vrot.lane.b32.xlu1 %v615_v23, %s2841_s1  ;;  %s3516_s1 = sshll.u32 %s2993_s22, 3 }
 0x239   : > { %s3050_s21 = scalar_lea.vmem [#allocation6], %s3516_s1 }
 0x23c   : > { %674 = vrot.lane.b32.xlu1 %v615_v23, %s2842_s24 }
 0x28e   : > { %v664_v28 = vpop.permute.xlu0 %663  ;;  %v632_v29 = vpop.permute.xlu1 %631 }
 0x28f   : > { %667 = vst.msk [vmem:[#allocation2 + $0x18] sm:$0xff] %vm618_vm2, %v664_v28  ;;  %635 = vst.msk [vmem:[#allocation2 + $0x8] sm:$0xff] %vm618_vm2, %v632_v29 }
 0x292   : > { %v669_v30 = vpop.permute.xlu0 %668  ;;  %v648_v31 = vpop.permute.xlu1 %647 }
 0x293   : > { %2190 = vst.msk [vmem:[#allocation3 + $0x18] sm:$0xff] %vm618_vm2, %v669_v30  ;;  %651 = vst.msk [vmem:[#allocation2 + $0x10] sm:$0xff] %vm618_vm2, %v648_v31 }
 0x296   : > { %v3035_v32 = vld [vmem:[#allocation2 + $0x18] sm:$0xff]  ;;  %v3037_v33 = vld [vmem:[#allocation2 + $0x8] sm:$0xff]  ;;  %v622_v34 = vpop.permute.xlu1 %621 }
 0x297   : > { %625 = vst.msk [vmem:[#allocation3] sm:$0xff] %vm618_vm2, %v622_v34 }
 0x29a   : > { %v3040_v35 = vld [vmem:[#allocation2 + $0x10] sm:$0xff]  ;;  %v627_v36 = vpop.permute.xlu1 %626 }
 0x29b   : > { %630 = vst.msk [vmem:[#allocation4] sm:$0xff] %vm618_vm2, %v627_v36 }
 0x29e   : > { %v637_v37 = vpop.permute.xlu1 %636 }
 0x29f   : > { %2186 = vst.msk [vmem:[#allocation3 + $0x8] sm:$0xff] %vm618_vm2, %v637_v37 }
 0x2a2   : > { %v643_v38 = vpop.permute.xlu1 %642 }
 0x2a3   : > { %2187 = vst.msk [vmem:[#allocation4 + $0x8] sm:$0xff] %vm618_vm2, %v643_v38 }
 0x2a6   : > { %v653_v39 = vpop.permute.xlu1 %652 }
 0x2a7   : > { %2188 = vst.msk [vmem:[#allocation3 + $0x10] sm:$0xff] %vm618_vm2, %v653_v39 }
 0x2aa   : > { %v659_v40 = vpop.permute.xlu1 %658 }
 0x2ab   : > { %2189 = vst.msk [vmem:[#allocation4 + $0x10] sm:$0xff] %vm618_vm2, %v659_v40 }
 0x2ae   : > { %v675_v41 = vpop.permute.xlu1 %674 }
 0x2af   : > { %2191 = vst.msk [vmem:[#allocation4 + $0x18] sm:$0xff] %vm618_vm2, %v675_v41 }
 0x2b0 LB: >> { %v2843_v46 = vmov 0.0   ;;  %vm2844_vm3 = vmmov 0   ;;  %s2192_s0 = sshll.u32 %s2792_s19, 3  ;;  %v3097_v51 = vand.u32 127, %v683_v26  ;;  %s2201_s24 = sshll.u32 %s2792_s19, 5  ;;  %s2792_s19 = sphi %s3064_s19, %s691_s19   ;;  %v2788_v45 = vphi %v3062_v45, %v3525_v45   ;;  %v2784_v44 = vphi %v3060_v44, %v3524_v44   ;;  %v2780_v43 = vphi %v3058_v43, %v3523_v43   ;;  %v2776_v42 = vphi %v3056_v42, %v3522_v42  }
 0x2b1   : >> { %2291 = vmatprep.subr.mxu0 %v2843_v46  ;;  %2293 = vmatprep.mubr.msk.f32.mxu0 %vm2844_vm3, %v2843_v46  ;;  %s699_s20 = scalar_lea.vmem [#allocation3], %s2192_s0  ;;  %v1014_v52 = vstv %s2192_s0  ;;  %s1024_s1 = scalar_lea.vmem [#allocation5], %s2201_s24 }
 0x2b2   : >> { %2296 = vmatprep.subr.mxu1 %v2843_v46  ;;  %2298 = vmatprep.mubr.msk.f32.mxu1 %vm2844_vm3, %v2843_v46  ;;  %v700_v47 = vld [vmem:[%s699_s20] sm:$0xff]  ;;  %v701_v48 = vld [vmem:[%s699_s20 + $0x8] sm:$0xff]  ;;  %v702_v49 = vld [vmem:[%s699_s20 + $0x10] sm:$0xff]  ;;  %v1015_v53 = vadd.s32 %v1014_v52, %v3097_v51  ;;  %s691_s19 = sadd.s32 1, %s2792_s19  }
 0x2b3   : >> { %2292 = vmatpush3.xpose.msk.msra.mxu0 %vm618_vm2, %v700_v47  ;;  %2297 = vmatpush3.xpose.msk.msra.mxu1 %vm618_vm2, %v701_v48  ;;  %v703_v50 = vld [vmem:[%s699_s20 + $0x18] sm:$0xff]  ;;  %p690_p12 = scmp.ge.s32.totalorder %s691_s19, 1 }
 0x2b4   : >> { %2301 = vmatprep.subr.mxu0 %v2843_v46  ;;  %2306 = vmatprep.subr.mxu1 %v2843_v46  ;;  %vm1016_vm4 = vcmp.ge.s32.totalorder %v3029_v27, %v1015_v53  ;;  %v3144_v20 = vmov (%p690_p12), 0.0   ;;  %v3146_v21 = vmov (%p690_p12), 0.0   ;;  %v3148_v22 = vmov (%p690_p12), 0.0   ;;  %s3160_s27 = smov (%p690_p12), 0  }
 0x2b5   : > { %v3150_v23 = vmov (%p690_p12), 0.0   ;;  %v3152_v24 = vmov (%p690_p12), 0.0   ;;  %v3154_v28 = vmov (%p690_p12), 0.0   ;;  %v3156_v29 = vmov (%p690_p12), 0.0  }
 0x2b6   : >> { %2294 = vmatmul.mubr.msk.f32.vlgmr.msra.gmra.mxu0 %vm618_vm2, %v3026_v25  ;;  %2299 = vmatmul.mubr.msk.f32.vlgmr.msra.gmra.mxu1 %vm618_vm2, %v3037_v33  ;;  %v3158_v30 = vmov (%p690_p12), 0.0  }
 0x2b7   : >> { %2302 = vmatpush3.xpose.msk.msra.mxu0 %vm618_vm2, %v702_v49  ;;  %2303 = vmatprep.mubr.msk.f32.mxu0 %vm2844_vm3, %v2843_v46 }
 0x2b8   : >> { %2307 = vmatpush3.xpose.msk.msra.mxu1 %vm618_vm2, %v703_v50  ;;  %2308 = vmatprep.mubr.msk.f32.mxu1 %vm2844_vm3, %v2843_v46 }
 0x2ba   : >> { %2304 = vmatmul.mubr.msk.f32.vlgmr.msra.gmra.mxu0 %vm618_vm2, %v3040_v35 }
 0x2bb   : >> { %2309 = vmatmul.mubr.msk.f32.vlgmr.msra.gmra.mxu1 %vm618_vm2, %v3035_v32 }
 0x376   : >> { %v776_v54 = vpop.f32.mrf.mxu0  ;;  %v852_v55 = vpop.f32.mrf.mxu1 }
 0x377   : >> { %v1008_v56 = vmul.f32 0.35355338, %v776_v54  ;;  %v1009_v57 = vmul.f32 0.35355338, %v852_v55 }
 0x378   : >> { %v2295_v58 = vpop.f32.mrf.mxu0  ;;  %v2300_v59 = vpop.f32.mrf.mxu1 }
 0x379   : >> { %v1019_v60 = vsel %vm1016_vm4, %v1008_v56, -1e+30  ;;  %v1020_v61 = vsel %vm1016_vm4, %v1009_v57, -1e+30 }
 0x37a   : >> { %v928_v62 = vpop.f32.mrf.mxu0  ;;  %v1029_v63 = vsel %vm618_vm2, %v1019_v60, -inf  ;;  %1025 = vst.msk [vmem:[%s1024_s1] sm:$0xff] %vm618_vm2, %v1019_v60  ;;  %1026 = vst.msk [vmem:[%s1024_s1 + $0x8] sm:$0xff] %vm618_vm2, %v1020_v61  ;;  %v1032_v5 = vsel %vm618_vm2, %v1020_v61, -inf }
 0x37b   : >> { %v1010_v1 = vmul.f32 0.35355338, %v928_v62  ;;  %1030 = vmax.xlane.f32.xlu0 %v1029_v63  ;;  %v1004_v2 = vpop.f32.mrf.mxu1 }
 0x37c   : >> { %v2305_v3 = vpop.f32.mrf.mxu0  ;;  %v1011_v4 = vmul.f32 0.35355338, %v1004_v2 }
 0x37d   : >> { %v2310_v6 = vpop.f32.mrf.mxu1  ;;  %v1021_v7 = vsel %vm1016_vm4, %v1010_v1, -1e+30 }
 0x37e   : >> { %v1035_v9 = vsel %vm618_vm2, %v1021_v7, -inf  ;;  %1027 = vst.msk [vmem:[%s1024_s1 + $0x10] sm:$0xff] %vm618_vm2, %v1021_v7  ;;  %v1022_v10 = vsel %vm1016_vm4, %v1011_v4, -1e+30 }
 0x37f   : >> { %1033 = vmax.xlane.f32.xlu0 %v1032_v5  ;;  %1036 = vmax.xlane.f32.xlu1 %v1035_v9  ;;  %1028 = vst.msk [vmem:[%s1024_s1 + $0x18] sm:$0xff] %vm618_vm2, %v1022_v10  ;;  %v1038_v11 = vsel %vm618_vm2, %v1022_v10, -inf }
 0x383   : >> { %1039 = vmax.xlane.f32.xlu1 %v1038_v11 }
 0x404   : >> { %v1031_v12 = vpop.xlane.xlu0 %1030 }
 0x405   : >> { %v3118_v45 = vmax.f32 %v2788_v45, %v1031_v12  }
 0x407   : >> { %v3518_v13 = vmov %v3118_v45 }
 0x408   : >> { %v1034_v14 = vpop.xlane.xlu0 %1033  ;;  %v1037_v15 = vpop.xlane.xlu1 %1036  ;;  %v3525_v45 = vmov %v3518_v13 }
 0x409   : >> { %v3121_v44 = vmax.f32 %v2784_v44, %v1034_v14   ;;  %v3124_v43 = vmax.f32 %v2780_v43, %v1037_v15  }
 0x40b   : >> { %v3519_v16 = vmov %v3121_v44  ;;  %v3520_v17 = vmov %v3124_v43 }
 0x40c   : >> { %v1040_v18 = vpop.xlane.xlu1 %1039  ;;  %v3523_v43 = vmov %v3520_v17  ;;  %v3524_v44 = vmov %v3519_v16  ;;  %693 = sbr.rel (!%p690_p12) target bundleno = 688 (0x2b0), region = 156 }
 0x40d   : >> { %v3127_v42 = vmax.f32 %v2776_v42, %v1040_v18  }
 0x40f   : >> { %v3521_v19 = vmov %v3127_v42 }
 0x410   : >> { %v3522_v42 = vmov %v3521_v19 }
 0x411 LB: >> { %v2845_v25 = vmov 0.0   ;;  %s2202_s19 = sshll.u32 %s2828_s27, 5  ;;  %s2203_s0 = sshll.u32 %s2828_s27, 3  ;;  %vm2846_vm5 = vmmov 0   ;;  %s2828_s27 = sphi %s3160_s27, %s1048_s27   ;;  %v2824_v30 = vphi %v3158_v30, %v3533_v30   ;;  %v2820_v29 = vphi %v3156_v29, %v3532_v29   ;;  %v2816_v28 = vphi %v3154_v28, %v3531_v28   ;;  %v2812_v24 = vphi %v3152_v24, %v3530_v24   ;;  %v2808_v23 = vphi %v3150_v23, %v3529_v23   ;;  %v2804_v22 = vphi %v3148_v22, %v3528_v22   ;;  %v2800_v21 = vphi %v3146_v21, %v3527_v21   ;;  %v2796_v20 = vphi %v3144_v20, %v3526_v20  }
 0x412   : >> { %2311 = vmatprep.subr.mxu0 %v2845_v25  ;;  %2316 = vmatprep.subr.mxu1 %v2845_v25  ;;  %s3193_s20 = scalar_lea.vmem [#allocation5], %s2202_s19  ;;  %s1098_s24 = scalar_lea.vmem [#allocation4], %s2203_s0 }
 0x413   : >> { %2313 = vmatprep.mubr.msk.f32.mxu0 %vm2846_vm5, %v2845_v25  ;;  %2318 = vmatprep.mubr.msk.f32.mxu1 %vm2846_vm5, %v2845_v25  ;;  %v1061_v26 = vld [vmem:[%s3193_s20] sm:$0xff]  ;;  %v1062_v31 = vld [vmem:[%s3193_s20 + $0x8] sm:$0xff]  ;;  %v1063_v32 = vld [vmem:[%s3193_s20 + $0x10] sm:$0xff]  ;;  %s1048_s27 = sadd.s32 1, %s2828_s27  }
 0x414   : >> { %v1064_v33 = vld [vmem:[%s3193_s20 + $0x18] sm:$0xff]  ;;  %v1065_v34 = vsub.f32 %v1061_v26, %v3518_v13  ;;  %v1066_v35 = vsub.f32 %v1062_v31, %v3519_v16  ;;  %v1067_v36 = vsub.f32 %v1063_v32, %v3520_v17  ;;  %v1099_v37 = vld [vmem:[%s1098_s24] sm:$0xff]  ;;  %v1100_v38 = vld [vmem:[%s1098_s24 + $0x8] sm:$0xff]  ;;  %p1047_p13 = scmp.ge.s32.totalorder %s1048_s27, 1 }
 0x415   : >> { %v1068_v39 = vsub.f32 %v1064_v33, %v3521_v19  ;;  %2312 = vmatpush3.msra.mxu0 %v1099_v37  ;;  %2317 = vmatpush3.msra.mxu1 %v1100_v38  ;;  %v1101_v44 = vld [vmem:[%s1098_s24 + $0x10] sm:$0xff]  ;;  %v1102_v46 = vld [vmem:[%s1098_s24 + $0x18] sm:$0xff]  ;;  %s3534_s5 = sld [smem:[#allocation18_spill]] (%p1047_p13)  ;;  %vm1413_vm6 = vcmp.ge.s32.totalorder (%p1047_p13), %v3029_v27, %v3097_v51  ;;  %s2228_s2 = sshll.u32 (%p1047_p13), %s2764_s16, 9 }
 0x416   : >> { %v1069_v40 = vmul.f32 1.442695, %v1065_v34  ;;  %v1071_v41 = vmul.f32 1.442695, %v1066_v35  ;;  %v1073_v42 = vmul.f32 1.442695, %v1067_v36  ;;  %2321 = vmatprep.subr.mxu0 %v2845_v25  ;;  %2326 = vmatprep.subr.mxu1 %v2845_v25  ;;  %s3411_s1 = scalar_lea.hbm (%p1047_p13), %s3498_s14, %s2228_s2 }
 0x417   : >> { %v1075_v43 = vmul.f32 1.442695, %v1068_v39  ;;  %s3535_s6 = sld [smem:[#allocation19_spill]] (%p1047_p13)  ;;  %s1990_s3 = sshll.u32 (%p1047_p13), %s3054_s28, 4  ;;  %s3413_s3 = int_to_ptr.vmem [resolvable:$true] %s1990_s3 }
 0x418   : >> { %2590 = vpow2.f32 %v1069_v40  ;;  %s3536_s7 = sld [smem:[#allocation20_spill]] (%p1047_p13)  ;;  %s2610_s27 = scalar_lea.vmem (%p1047_p13), %s3413_s3, 512 }
 0x419   : >> { %2592 = vpow2.f32 %v1071_v41  ;;  %p2611_p0 = scmp.ne.s32.totalorder (%p1047_p13), %s3413_s3, %s2610_s27  ;;  %s2847_s0 = smov (%p1047_p13), [#allocation8]  }
 0x41a   : >> { %2594 = vpow2.f32 %v1073_v42  ;;  %s2614_s4 = sshll.u32 (%p1047_p13), %s2847_s0, 4  ;;  %s2615_s4 = int_to_ptr.vmem [resolvable:$false] %s2614_s4 }
 0x41b   : >> { %2596 = vpow2.f32 %v1075_v43  ;;  %v2208_v14 = vld [vmem:[%s3534_s5 + $0x8] sm:$0xff] (%p1047_p13)  ;;  %v1432_v17 = vld [vmem:[%s3534_s5] sm:$0xff] (%p1047_p13)  ;;  %p2612_p1 = pnand (%p1047_p13), %p2611_p0, %p2966_p4  ;;  %p2617_p3 = scmp.lt.s32.totalorder (%p1047_p13), %s3413_s3, %s2615_s4 }
 0x41d   : > { %v2215_v35 = vld [vmem:[%s3535_s6] ss:$0 sm:$0xff] (%p1047_p13)  ;;  %p2613_p2 = pneg (%p1047_p13), %p2612_p1 }
 0x425   : >> { %v2591_v45 = vpop.eup %2590 }
 0x426   : >> { %v2593_v47 = vpop.eup %2592  ;;  %1077 = vst.msk [vmem:[%s3193_s20] sm:$0xff] %vm618_vm2, %v2591_v45  ;;  %2314 = vmatmul.mubr.msk.f32.vlgmr.msra.gmra.mxu0 %vm618_vm2, %v2591_v45  ;;  %v1081_v49 = vsel %vm618_vm2, %v2591_v45, 0.0 }
 0x427   : >> { %v2595_v48 = vpop.eup %2594  ;;  %1078 = vst.msk [vmem:[%s3193_s20 + $0x8] sm:$0xff] %vm618_vm2, %v2593_v47  ;;  %2319 = vmatmul.mubr.msk.f32.vlgmr.msra.gmra.mxu1 %vm618_vm2, %v2593_v47  ;;  %2322 = vmatpush3.msra.mxu0 %v1101_v44  ;;  %v1084_v54 = vsel %vm618_vm2, %v2593_v47, 0.0  ;;  %v1772_v47 = vld [vmem:[%s3493_s9 + $0x8] sm:$0xff] (%p1047_p13) }
 0x428   : >> { %v2597_v50 = vpop.eup %2596  ;;  %1079 = vst.msk [vmem:[%s3193_s20 + $0x10] sm:$0xff] %vm618_vm2, %v2595_v48  ;;  %2327 = vmatpush3.msra.mxu1 %v1102_v46  ;;  %2323 = vmatprep.mubr.msk.f32.mxu0 %vm2846_vm5, %v2845_v25  ;;  %v1087_v52 = vsel %vm618_vm2, %v2595_v48, 0.0  ;;  %v1774_v46 = vld [vmem:[%s3493_s9 + $0x18] sm:$0xff] (%p1047_p13) }
 0x429   : >> { %1080 = vst.msk [vmem:[%s3193_s20 + $0x18] sm:$0xff] %vm618_vm2, %v2597_v50  ;;  %2328 = vmatprep.mubr.msk.f32.mxu1 %vm2846_vm5, %v2845_v25  ;;  %1088 = vadd.xlane.f32.xlu1 %v1087_v52  ;;  %v1090_v53 = vsel %vm618_vm2, %v2597_v50, 0.0  ;;  %v1874_v52 = vld [vmem:[%s3495_s11 + $0x68] sm:$0xff] (%p1047_p13) }
 0x42a   : >> { %2324 = vmatmul.mubr.msk.f32.vlgmr.msra.gmra.mxu0 %vm618_vm2, %v2595_v48  ;;  %1082 = vadd.xlane.f32.xlu0 %v1081_v49  ;;  %v1771_v48 = vld [vmem:[%s3493_s9] sm:$0xff] (%p1047_p13)  ;;  %v1876_v49 = vld [vmem:[%s3495_s11 + $0x78] sm:$0xff] (%p1047_p13) }
 0x42b   : >> { %2329 = vmatmul.mubr.msk.f32.vlgmr.msra.gmra.mxu1 %vm618_vm2, %v2597_v50  ;;  %2331 = vmatprep.subr.mxu0 (%p1047_p13), %v2830_v8  ;;  %v1875_v50 = vld [vmem:[%s3495_s11 + $0x70] sm:$0xff] (%p1047_p13) }
 0x42c   : > { %2333 = vmatprep.mubr.msk.f32.mxu0 (%p1047_p13), %vm2831_vm1, %v2830_v8  ;;  %2332 = vmatpush3.msra.mxu0 (%p1047_p13), %v2208_v14  ;;  %v2218_v14 = vld [vmem:[%s3494_s10] ss:$0 sm:$0xff] (%p1047_p13) }
 0x42d   : >> { %1091 = vadd.xlane.f32.xlu1 %v1090_v53  ;;  %2362 = vmatprep.subr.mxu1 (%p1047_p13), %v2830_v8  ;;  %v1873_v53 = vld [vmem:[%s3495_s11 + $0x60] sm:$0xff] (%p1047_p13) }
 0x42e   : >> { %1085 = vadd.xlane.f32.xlu0 %v1084_v54  ;;  %2336 = vmatprep.subr.mxu0 (%p1047_p13), %v2830_v8 }
 0x42f   : > { %2394 = vmatprep.mubr.msk.f32.mxu1 (%p1047_p13), %vm2831_vm1, %v2830_v8  ;;  %2363 = vmatpush3.msra.mxu1 (%p1047_p13), %v1876_v49 }
 0x430   : > { %2364 = vmatprep.subr.mxu1 (%p1047_p13), %v2830_v8 }
 0x431   : > { %2365 = vmatpush3.msra.mxu1 (%p1047_p13), %v1875_v50 }
 0x432   : > { %2366 = vmatprep.subr.mxu1 (%p1047_p13), %v2830_v8 }
 0x433   : > { %2367 = vmatpush3.msra.mxu1 (%p1047_p13), %v1874_v52 }
 0x434   : > { %2368 = vmatprep.subr.mxu1 (%p1047_p13), %v2830_v8 }
 0x435   : > { %2369 = vmatpush3.msra.mxu1 (%p1047_p13), %v1873_v53 }
 0x436   : > { %2370 = vmatprep.subr.mxu1 (%p1047_p13), %v2830_v8 }
 0x4b2   : >> { %v1089_v55 = vpop.xlane.xlu1 %1088 }
 0x4b3   : >> { %v1095_v56 = vadd.f32 %v2816_v28, %v1089_v55   ;;  %v1083_v57 = vpop.xlane.xlu0 %1082 }
 0x4b4   : >> { %v1093_v58 = vadd.f32 %v2824_v30, %v1083_v57  }
 0x4b5   : >> { %v3531_v28 = vmov %v1095_v56 }
 0x4b6   : >> { %v1092_v59 = vpop.xlane.xlu1 %1091  ;;  %v3533_v30 = vmov %v1093_v58 }
 0x4b7   : >> { %v1096_v60 = vadd.f32 %v2812_v24, %v1092_v59   ;;  %v1086_v61 = vpop.xlane.xlu0 %1085 }
 0x4b8   : >> { %v1094_v62 = vadd.f32 %v2820_v29, %v1086_v61  }
 0x4b9   : >> { %v3530_v24 = vmov %v1096_v60 }
 0x4ba   : >> { %v3532_v29 = vmov %v1094_v62  ;;  %2598 = vrcp.f32 (%p1047_p13), %v1094_v62 }
 0x4bb   : > { %2600 = vrcp.f32 (%p1047_p13), %v1093_v58  ;;  %v2216_v58 = vld [vmem:[%s3536_s7] ss:$0 sm:$0xff] (%p1047_p13) }
 0x4bc   : > { %2602 = vrcp.f32 (%p1047_p13), %v1095_v56 }
 0x4bd   : > { %2604 = vrcp.f32 (%p1047_p13), %v1096_v60  ;;  %v2217_v60 = vld [vmem:[%s3492_s8] ss:$0 sm:$0xff] (%p1047_p13) }
 0x4c7   : > { %v3258_v13 = vpop.eup (%p1047_p13), %2598 }
 0x4c8   : > { %v3260_v15 = vpop.eup (%p1047_p13), %2600 }
 0x4c9   : > { %v3268_v19 = vpop.eup (%p1047_p13), %2602 }
 0x4e6   : >> { %v1172_v63 = vpop.f32.mrf.mxu0 }
 0x4e7   : >> { %v1395_v1 = vadd.f32 %v2808_v23, %v1172_v63   ;;  %v1245_v2 = vpop.f32.mrf.mxu1  ;;  %v1872_v63 = vld [vmem:[%s3495_s11 + $0x58] sm:$0xff] (%p1047_p13) }
 0x4e8   : >> { %v1396_v3 = vadd.f32 %v2804_v22, %v1245_v2   ;;  %v2315_v4 = vpop.f32.mrf.mxu0  ;;  %2371 = vmatpush3.msra.mxu1 (%p1047_p13), %v1872_v63  ;;  %v1870_v2 = vld [vmem:[%s3495_s11 + $0x48] sm:$0xff] (%p1047_p13) }
 0x4e9   : >> { %v2320_v5 = vpop.f32.mrf.mxu1  ;;  %v3529_v23 = vmov %v1395_v1  ;;  %v1428_v18 = vmul.f32 (%p1047_p13), %v3260_v15, %v1395_v1  ;;  %2372 = vmatprep.subr.mxu1 (%p1047_p13), %v2830_v8  ;;  %v1871_v1 = vld [vmem:[%s3495_s11 + $0x50] sm:$0xff] (%p1047_p13)  ;;  %v1868_v4 = vld [vmem:[%s3495_s11 + $0x38] sm:$0xff] (%p1047_p13) }
 0x4ea   : >> { %v1318_v6 = vpop.f32.mrf.mxu0  ;;  %v3528_v22 = vmov %v1396_v3  ;;  %1050 = sbr.rel (!%p1047_p13) target bundleno = 1041 (0x411), region = 167  ;;  %v1429_v16 = vmul.f32 (%p1047_p13), %v3258_v13, %v1396_v3  ;;  %v2213_v23 = vld [vmem:[%s3534_s5 + $0x18] sm:$0xff] (%p1047_p13)  ;;  %2373 = vmatpush3.msra.mxu1 (%p1047_p13), %v1871_v1  ;;  %v1869_v3 = vld [vmem:[%s3495_s11 + $0x40] sm:$0xff] (%p1047_p13)  ;;  %v1867_v5 = vld [vmem:[%s3495_s11 + $0x30] sm:$0xff] (%p1047_p13) }
 0x4eb   : >> { %v1397_v7 = vadd.f32 %v2800_v21, %v1318_v6   ;;  %v1391_v9 = vpop.f32.mrf.mxu1  ;;  %v3278_v22 = vpop.eup (%p1047_p13), %2604  ;;  %2374 = vmatprep.subr.mxu1 (%p1047_p13), %v2830_v8  ;;  %v1866_v6 = vld [vmem:[%s3495_s11 + $0x28] sm:$0xff] (%p1047_p13) }
 0x4ec   : >> { %v1398_v10 = vadd.f32 %v2796_v20, %v1391_v9   ;;  %v2325_v11 = vpop.f32.mrf.mxu0  ;;  %2334 = vmatmul.mubr.msk.f32.vlgmr.msra.gmra.mxu0 (%p1047_p13), %vm618_vm2, %v1429_v16  ;;  %2375 = vmatpush3.msra.mxu1 (%p1047_p13), %v1870_v2  ;;  %v1864_v9 = vld [vmem:[%s3495_s11 + $0x18] sm:$0xff] (%p1047_p13) }
 0x4ed   : >> { %v2330_v12 = vpop.f32.mrf.mxu1  ;;  %v3527_v21 = vmov %v1397_v7  ;;  %2337 = vmatpush3.msra.mxu0 (%p1047_p13), %v1432_v17  ;;  %2338 = vmatprep.mubr.msk.f32.mxu0 (%p1047_p13), %vm2831_vm1, %v2830_v8  ;;  %v1862_v11 = vld [vmem:[%s3495_s11 + $0x8] sm:$0xff] (%p1047_p13) }
 0x4ee   : >> { %v3526_v20 = vmov %v1398_v10  ;;  %2341 = vmatprep.subr.mxu0 (%p1047_p13), %v2830_v8  ;;  %v1430_v21 = vmul.f32 (%p1047_p13), %v3268_v19, %v1397_v7  ;;  %v1431_v24 = vmul.f32 (%p1047_p13), %v3278_v22, %v1398_v10  ;;  %2376 = vmatprep.subr.mxu1 (%p1047_p13), %v2830_v8  ;;  %v1865_v7 = vld [vmem:[%s3495_s11 + $0x20] sm:$0xff] (%p1047_p13)  ;;  %v1863_v10 = vld [vmem:[%s3495_s11 + $0x10] sm:$0xff] (%p1047_p13) }
 0x4ef   : > { %v2211_v20 = vld [vmem:[%s3534_s5 + $0x10] sm:$0xff]  ;;  %2377 = vmatpush3.msra.mxu1 %v1869_v3  ;;  %v1861_v12 = vld [vmem:[%s3495_s11] sm:$0xff] }
 0x4f0   : > { %2339 = vmatmul.mubr.msk.f32.vlgmr.msra.gmra.mxu0 %vm618_vm2, %v1428_v18  ;;  %2378 = vmatprep.subr.mxu1 %v2830_v8 }
 0x4f1   : > { %2342 = vmatpush3.msra.mxu0 %v2211_v20  ;;  %2343 = vmatprep.mubr.msk.f32.mxu0 %vm2831_vm1, %v2830_v8 }
 0x4f2   : > { %2346 = vmatprep.subr.mxu0 %v2830_v8  ;;  %2379 = vmatpush3.msra.mxu1 %v1868_v4 }
 0x4f3   : > { %2380 = vmatprep.subr.mxu1 %v2830_v8 }
 0x4f4   : > { %2344 = vmatmul.mubr.msk.f32.vlgmr.msra.gmra.mxu0 %vm618_vm2, %v1430_v21  ;;  %2381 = vmatpush3.msra.mxu1 %v1867_v5 }
 0x4f5   : > { %2347 = vmatpush3.msra.mxu0 %v2213_v23  ;;  %2348 = vmatprep.mubr.msk.f32.mxu0 %vm2831_vm1, %v2830_v8 }
 0x4f6   : > { %2351 = vmatprep.subr.mxu0 %v2830_v8  ;;  %2382 = vmatprep.subr.mxu1 %v2830_v8 }
 0x4f7   : > { %2383 = vmatpush3.msra.mxu1 %v1866_v6 }
 0x4f8   : > { %2349 = vmatmul.mubr.msk.f32.vlgmr.msra.gmra.mxu0 %vm618_vm2, %v1431_v24  ;;  %2384 = vmatprep.subr.mxu1 %v2830_v8 }
 0x4f9   : > { %2359 = vmatprep.mubr.msk.f32.mxu0 %vm2831_vm1, %v2830_v8  ;;  %2352 = vmatpush3.msra.mxu0 %v1774_v46 }
 0x4fa   : > { %2353 = vmatprep.subr.mxu0 %v2830_v8  ;;  %2385 = vmatpush3.msra.mxu1 %v1865_v7 }
 0x4fb   : > { %2386 = vmatprep.subr.mxu1 %v2830_v8 }
 0x4fc   : > { %2387 = vmatpush3.msra.mxu1 %v1864_v9 }
 0x4fd   : > { %2388 = vmatprep.subr.mxu1 %v2830_v8 }
 0x4fe   : > { %2389 = vmatpush3.msra.mxu1 %v1863_v10 }
 0x4ff   : > { %2390 = vmatprep.subr.mxu1 %v2830_v8 }
 0x500   : > { %2391 = vmatpush3.msra.mxu1 %v1862_v11 }
 0x501   : > { %2392 = vmatprep.subr.mxu1 %v2830_v8 }
 0x502   : > { %2393 = vmatpush3.msra.mxu1 %v1861_v12 }
 0x5ac   : > { %v1504_v28 = vpop.f32.mrf.mxu0 }
 0x5ae   : > { %v2335_v29 = vpop.f32.mrf.mxu0 }
 0x5af   : > { %v1407_v29 = vld [vmem:[#allocation5] sm:$0xff] }
 0x5b0   : > { %v1577_v30 = vpop.f32.mrf.mxu0 }
 0x5b1   : > { %v1578_v31 = vadd.f32 %v1577_v30, %v1504_v28  ;;  %v1409_v30 = vld [vmem:[#allocation5 + $0x10] sm:$0xff] }
 0x5b2   : > { %v2340_v25 = vpop.f32.mrf.mxu0 }
 0x5b3   : > { %v1410_v25 = vld [vmem:[#allocation5 + $0x18] sm:$0xff] }
 0x5b4   : > { %v1652_v26 = vpop.f32.mrf.mxu0 }
 0x5b5   : > { %v1656_v33 = vadd.f32 %v1652_v26, %v1578_v31  ;;  %v1414_v26 = vmul.f32 %v3260_v15, %v1407_v29 }
 0x5b6   : > { %v2345_v32 = vpop.f32.mrf.mxu0 }
 0x5b7   : > { %v1416_v32 = vmul.f32 %v3268_v19, %v1409_v30 }
 0x5b8   : > { %v1728_v34 = vpop.f32.mrf.mxu0 }
 0x5b9   : > { %v1732_v36 = vadd.f32 %v1728_v34, %v1656_v33  ;;  %v1417_v33 = vmul.f32 %v3278_v22, %v1410_v25  ;;  %v1420_v34 = vsel %vm1413_vm6, %v1414_v26, 0.0 }
 0x5ba   : > { %v2350_v37 = vpop.f32.mrf.mxu0  ;;  %1424 = vst.msk [vmem:[%s3054_s28] sm:$0xff] %vm618_vm2, %v1420_v34 }
 0x5bb   : > { %v1740_v38 = vadd.f32 %v2215_v35, %v1732_v36  ;;  %v1422_v36 = vsel %vm1413_vm6, %v1416_v32, 0.0  ;;  %v1423_v37 = vsel %vm1413_vm6, %v1417_v33, 0.0 }
 0x5bc   : > { %1426 = vst.msk [vmem:[%s3054_s28 + $0x10] sm:$0xff] %vm618_vm2, %v1422_v36  ;;  %1427 = vst.msk [vmem:[%s3054_s28 + $0x18] sm:$0xff] %vm618_vm2, %v1423_v37 }
 0x5bd   : > { %v3298_v39 = vadd.f32 %v1740_v38, %v2986_v0  ;;  %v1773_v0 = vld [vmem:[%s3493_s9 + $0x10] sm:$0xff] }
 0x5be   : > { %2354 = vmatpush3.msra.mxu0 %v1773_v0 }
 0x5bf   : > { %v1744_v40 = vsel %vm505_vm0, %v3298_v39, 0.0  ;;  %2355 = vmatprep.subr.mxu0 %v2830_v8 }
 0x5c0   : > { %1745 = vadd.xlane.f32.xlu0 %v1744_v40  ;;  %2356 = vmatpush3.msra.mxu0 %v1772_v47 }
 0x5c1   : > { %2357 = vmatprep.subr.mxu0 %v2830_v8  ;;  %v1408_v8 = vld [vmem:[#allocation5 + $0x8] sm:$0xff] }
 0x5c2   : > { %2358 = vmatpush3.msra.mxu0 %v1771_v48  ;;  %v1415_v31 = vmul.f32 %v3258_v13, %v1408_v8 }
 0x5c4   : > { %v1421_v35 = vsel %vm1413_vm6, %v1415_v31, 0.0 }
 0x5c5   : > { %1425 = vst.msk [vmem:[%s3054_s28 + $0x8] sm:$0xff] %vm618_vm2, %v1421_v35  ;;  %s2616_s28 = scalar_lea.vmem %s2615_s4, 1024 }
 0x5c6   : > { %p2618_p5 = scmp.lt.s32.totalorder %s2616_s28, %s2610_s27 }
 0x5c8   : > { %p2619_p6 = por %p2618_p5, %p2617_p3 }
 0x5ca   : > { %p2620_p7 = pnand %p2619_p6, %p2613_p2 }
 0x649   : > { %v1746_v41 = vpop.xlane.xlu0 %1745 }
 0x64a   : > { %v1747_v42 = vmul.f32 0.03125, %v1746_v41 }
 0x64c   : > { %v1748_v43 = vsub.f32 %v3298_v39, %v1747_v42 }
 0x64e   : > { %v1749_v44 = vmul.f32 %v1748_v43, %v1748_v43 }
 0x650   : > { %v1750_v45 = vsel %vm505_vm0, %v1749_v44, 0.0 }
 0x651   : > { %1751 = vadd.xlane.f32.xlu0 %v1750_v45 }
 0x6da   : > { %v1752_v54 = vpop.xlane.xlu0 %1751 }
 0x6db   : > { %v1753_v55 = vmul.f32 0.03125, %v1752_v54 }
 0x6dd   : > { %v1754_v56 = vadd.f32 1e-05, %v1753_v55 }
 0x6df   : > { %2606 = vrsqrt.f32 %v1754_v56 }
 0x6ec   : > { %v2607_v57 = vpop.eup %2606 }
 0x6ed   : > { %v1756_v59 = vmul.f32 %v2607_v57, %v1748_v43 }
 0x6ef   : > { %v1763_v61 = vmul.f32 %v2216_v58, %v1756_v59 }
 0x6f1   : > { %v1770_v62 = vadd.f32 %v2217_v60, %v1763_v61 }
 0x6f3   : > { %2360 = vmatmul.mubr.msk.f32.vlgmr.msra.gmra.mxu0 %vm505_vm0, %v1770_v62 }
 0x7b3   : > { %v1851_v16 = vpop.f32.mrf.mxu0 }
 0x7b4   : > { %v1852_v17 = vadd.f32 %v2218_v14, %v1851_v16 }
 0x7b5   : > { %v2361_v18 = vpop.f32.mrf.mxu0 }
 0x7b6   : > { %v1857_v20 = vmul.f32 0.70710677, %v1852_v17  ;;  %v1855_v23 = vmul.f32 0.5, %v1852_v17 }
 0x7b8   : > { %2608 = verf.f32 %v1857_v20 }
 0x7c5   : > { %v2609_v21 = vpop.eup %2608 }
 0x7c6   : > { %v1859_v24 = vadd.f32 1.0, %v2609_v21 }
 0x7c8   : > { %v1860_v28 = vmul.f32 %v1859_v24, %v1855_v23 }
 0x7ca   : > { %2395 = vmatmul.mubr.f32.vlgmr.msra.gmra.mxu1 %v1860_v28 }
 0x7cb   : > { %2623 = shalt.err (!%p2620_p7)
}
 0x7cc   : > { %s2624_s2 = scalar_lea.hbm %s3411_s1, 512  ;;  %s2628_s0 = scalar_lea.hbm %s3498_s14, 1024 }
 0x7cd   : > { %p2625_p9 = scmp.ne.s32.totalorder %s3411_s1, %s2624_s2  ;;  %p2629_p12 = scmp.lt.s32.totalorder %s3411_s1, %s3498_s14 }
 0x7ce   : > { %p2630_p13 = scmp.lt.s32.totalorder %s2628_s0, %s2624_s2 }
 0x7cf   : > { %p2626_p10 = pnand %p2625_p9, %p2966_p4 }
 0x7d0   : > { %p2631_p0 = por %p2630_p13, %p2629_p12 }
 0x7d1   : > { %p2627_p11 = pneg %p2626_p10 }
 0x7d3   : > { %p2632_p1 = pnand %p2631_p0, %p2627_p11 }
 0x7d5   : > { %2635 = shalt.err (!%p2632_p1)
}
 0x7d6   : > { %s2848_s4 = smov 128   ;;  %s2849_s27 = smov 8   ;;  %v2220_v27 = vld [vmem:[%s3496_s12] ss:$0 sm:$0xff] }
 0x7d7   : > { %s3537_s28 = scalar_lea.sflag [#allocation9], %s2993_s22  ;;  %s2223_s2 = sshll.u32 %s2764_s16, 7 }
 0x7d8   : > { %2398 = dma.vmem_to_hbm [thread:$0]  (%p2966_p4), %s3413_s3, 512, %s3411_s1, %s3537_s28, %s2848_s4, %s2848_s4, %s2849_s27  }
 0x7d9   : > { %s1976_s20 = sshll.u32 %s3050_s21, 4  ;;  %s1974_s6 = scalar_lea.hbm %s3497_s13, %s2223_s2  ;;  %s1977_s20 = int_to_ptr.vmem [resolvable:$true] %s1976_s20 }
 0x7da   : > { %s1957_s7 = scalar_lea.sflag [#allocation7], %s2993_s22  ;;  %s2636_s3 = scalar_lea.vmem %s1977_s20, 128 }
 0x7db   : > { %p2637_p2 = scmp.ne.s32.totalorder %s1977_s20, %s2636_s3  ;;  %s2850_s1 = smov [#allocation6]  }
 0x7dc   : > { %s2640_s16 = sshll.u32 %s2850_s1, 4  ;;  %s2641_s16 = int_to_ptr.vmem [resolvable:$false] %s2640_s16 }
 0x7dd   : > { %p2638_p3 = pnand %p2637_p2, %p2966_p4  ;;  %s2642_s4 = scalar_lea.vmem %s2641_s16, 256 }
 0x7de   : > { %p2643_p6 = scmp.lt.s32.totalorder %s1977_s20, %s2641_s16  ;;  %p2644_p7 = scmp.lt.s32.totalorder %s2642_s4, %s2636_s3 }
 0x7df   : > { %p2639_p5 = pneg %p2638_p3 }
 0x7e0   : > { %p2645_p9 = por %p2644_p7, %p2643_p6 }
 0x7e2   : > { %p2646_p10 = pnand %p2645_p9, %p2639_p5 }
 0x88a   : > { %v1950_v51 = vpop.f32.mrf.mxu1 }
 0x88b   : > { %v1951_v13 = vadd.f32 %v2220_v27, %v1950_v51 }
 0x88c   : > { %v2396_v15 = vpop.f32.mrf.mxu1 }
 0x88d   : > { %v1954_v19 = vadd.f32 %v1951_v13, %v3298_v39 }
 0x88f   : > { %1955 = vst.msk [vmem:[%s3050_s21] sm:$0xff] %vm505_vm0, %v1954_v19 }
 0x890   : > { %2649 = shalt.err (!%p2646_p10)
}
 0x891   : > { %s2650_s27 = scalar_lea.hbm %s1974_s6, 128  ;;  %s2654_s28 = scalar_lea.hbm %s3497_s13, 256 }
 0x892   : > { %p2651_p11 = scmp.ne.s32.totalorder %s1974_s6, %s2650_s27  ;;  %p2655_p0 = scmp.lt.s32.totalorder %s1974_s6, %s3497_s13 }
 0x893   : > { %p2656_p1 = scmp.lt.s32.totalorder %s2654_s28, %s2650_s27 }
 0x894   : > { %p2652_p12 = pnand %p2651_p11, %p2966_p4 }
 0x895   : > { %p2657_p2 = por %p2656_p1, %p2655_p0 }
 0x896   : > { %p2653_p13 = pneg %p2652_p12 }
 0x898   : > { %p2658_p3 = pnand %p2657_p2, %p2653_p13 }
 0x89a   : > { %2661 = shalt.err (!%p2658_p3)
}
 0x89b   : > { %2397 = dma.vmem_to_hbm [thread:$0]  (%p2966_p4), %s1977_s20, 128, %s1974_s6, %s1957_s7  }
 0x89c PF: > { %p2408_p5 = scmp.ge.s32.totalorder %s2772_s18, 2  ;;  %s2005_s2 = sand.u32 1, %s2752_s29  }
 0x89d   : > { %s2006_s24 = scalar_lea.sflag [#allocation7], %s2005_s2 }
 0x89e   : > { %p2402_p6 = pnand %p2408_p5, %p2973_p8 }
 0x8a0   : > { %p2403_p7 = pneg %p2402_p6 }
 0x8a2   : > { %2743 = dma.done.wait (%p2403_p7), %s2006_s24, 128  }
 0x8a3   : > { %2745 = vsyncadd (%p2403_p7), %s2006_s24, 4294967168  ;;  %s2015_s0 = scalar_lea.sflag [#allocation9], %s2005_s2 }
 0x8a4   : > { %2747 = dma.done.wait (%p2403_p7), %s2015_s0, 512  }
 0x8a5   : > { %2749 = vsyncadd (%p2403_p7), %s2015_s0, 4294966784  ;;  %s31_s18 = sadd.s32 1, %s2772_s18   ;;  %s3538_s6 = sld [smem:[#allocation12_spill]] }
 0x8a6   : > { %p28_p9 = scmp.ge.s32.totalorder %s31_s18, 4   ;;  %s3539_s29 = smov %s2756_s30 }
 0x8a7   : > { %s3540_s30 = smov %s2760_s15  ;;  %s3541_s15 = smov %s2979_s26 }
 0x8a8   : > { %s3542_s16 = smov %s2768_s17  ;;  %30 = sbr.rel (!%p28_p9) target bundleno = 15 (0xf), region = 178 }
 0x8ab   : > { %s3543_s17 = smov %s3538_s6 }
 0x8ad   :  { %2020 = vsyncpa [#allocation7], 1 }
 0x8ae   :  { %2022 = vsyncpa [#allocation7 + $0x1], 1 }
 0x8af   :  { %2023 = vsyncpa [#allocation9], 1 }
 0x8b0   :  { %2025 = vsyncpa [#allocation9 + $0x1], 1 }

</bundles_post_ra>
